<compile_context>
chip_gen: v5e
topology: v5e:2x2
jax: 0.10.0
libtpu: 0.0.40
codegen_flags: <defaults>
</compile_context>

<pallas_src>
import functools

import jax
import jax.numpy as jnp
from jax.experimental import pallas as pl
from jax.experimental.pallas import tpu as pltpu


_MAXIMUM_LAYER_NODE = {"huge": 8192, "large": 4096, "base": 2048, "small": 256}
_LN_EPS = 1e-6


def _round_up(x, m):
    return ((x + m - 1) // m) * m


@functools.lru_cache(maxsize=1)
def _vmem_limit_bytes():
    """Generation-aware VMEM budget: ~3/4 of per-core VMEM, capped at 96 MiB."""
    try:
        cap = int(pltpu.get_tpu_info().vmem_capacity_bytes)
    except Exception:
        cap = 64 << 20  # conservative fallback (v7x-sized)
    return max(32 << 20, min((cap * 3) // 4, 96 << 20))


def _batch_blocking(B):
    """Pick (padded batch, batch block).  Small batches -> one block of
    round_up(B, 8) rows; large batches -> 256-row blocks (fills the v6e/v7x
    256x256 MXU, fine on v5e) on a 'parallel' grid axis."""
    Bp = _round_up(B, 8)
    if Bp <= 256:
        return Bp, Bp
    Bp = _round_up(B, 256)
    return Bp, 256


# ----------------------------------------------------------------------------
# Fused Pallas kernel: pooled patch-embed -> LayerNorm -> folded chain -> head
# ----------------------------------------------------------------------------
def _euda_fused_kernel(xm_ref, pw_ref, pb_ref, g_ref, beta_ref,
                       wf_ref, bf_ref, hw_ref, hb_ref,
                       feat_ref, logit_ref):
    """xm_ref: (bb, Kpad) bf16 patch-pooled pixels.  Weights bf16, biases f32.
    Outputs: bottleneck features (bb, 256) f32, lane-padded logits (bb, Npad) f32.
    All intermediates stay in VMEM / vregs; MXU accumulates in f32."""
    xm = xm_ref[...]                                                 # (bb, Kpad) bf16

    # Patch embedding on the pooled patch vector (pool commutes with affine).
    emb = jnp.dot(xm, pw_ref[...],
                  preferred_element_type=jnp.float32) + pb_ref[...]  # (bb, D) f32

    # LayerNorm surrogate for the backbone's final norm.
    mu = jnp.mean(emb, axis=-1, keepdims=True)
    var = jnp.mean((emb - mu) ** 2, axis=-1, keepdims=True)
    feats_bb = (emb - mu) * jax.lax.rsqrt(var + _LN_EPS)
    feats_bb = feats_bb * g_ref[...] + beta_ref[...]                 # (bb, D) f32

    # Folded activation-free bottleneck chain: one (D x 256) matmul.
    feats = jnp.dot(feats_bb.astype(jnp.bfloat16), wf_ref[...],
                    preferred_element_type=jnp.float32) + bf_ref[...]  # (bb, 256)
    feat_ref[...] = feats.astype(feat_ref.dtype)

    # Classification head (lane-padded to Npad).
    logits = jnp.dot(feats.astype(jnp.bfloat16), hw_ref[...],
                     preferred_element_type=jnp.float32) + hb_ref[...]
    logit_ref[...] = logits.astype(logit_ref.dtype)


def pallas_euda_fused(xm, patch_w, patch_b, ln_gamma, ln_beta,
                      w_fold, b_fold, head_w, head_b, *, block_b):
    """xm: [Bp, Kpad] bf16 pooled patches -> (features [Bp, 256] f32,
    lane-padded logits [Bp, Npad] f32)."""
    Bp, Kp = xm.shape
    D = patch_w.shape[1]
    F = w_fold.shape[1]
    Np = head_w.shape[1]
    assert Bp % block_b == 0 and Kp % 128 == 0 and D % 128 == 0
    assert F % 128 == 0 and Np % 128 == 0

    grid = (Bp // block_b,)
    return pl.pallas_call(
        _euda_fused_kernel,
        out_shape=(
            jax.ShapeDtypeStruct((Bp, F), jnp.float32),
            jax.ShapeDtypeStruct((Bp, Np), jnp.float32),
        ),
        grid_spec=pltpu.PrefetchScalarGridSpec(
            num_scalar_prefetch=0,
            grid=grid,
            in_specs=[
                pl.BlockSpec((block_b, Kp), lambda i: (i, 0)),   # pooled patches
                pl.BlockSpec((Kp, D), lambda i: (0, 0)),         # patch_w (resident)
                pl.BlockSpec((1, D), lambda i: (0, 0)),          # patch_b
                pl.BlockSpec((1, D), lambda i: (0, 0)),          # ln_gamma
                pl.BlockSpec((1, D), lambda i: (0, 0)),          # ln_beta
                pl.BlockSpec((D, F), lambda i: (0, 0)),          # folded bottleneck W
                pl.BlockSpec((1, F), lambda i: (0, 0)),          # folded bottleneck b
                pl.BlockSpec((F, Np), lambda i: (0, 0)),         # head W
                pl.BlockSpec((1, Np), lambda i: (0, 0)),         # head b
            ],
            out_specs=[
                pl.BlockSpec((block_b, F), lambda i: (i, 0)),
                pl.BlockSpec((block_b, Np), lambda i: (i, 0)),
            ],
        ),
        compiler_params=pltpu.CompilerParams(
            dimension_semantics=("parallel",),
            vmem_limit_bytes=_vmem_limit_bytes(),
        ),
    )(xm, patch_w, patch_b, ln_gamma, ln_beta, w_fold, b_fold, head_w, head_b)


# ----------------------------------------------------------------------------
# EUDA model (deterministic synthetic parameters)
# ----------------------------------------------------------------------------
def _init_linear(key, fan_in, fan_out):
    kw, kb = jax.random.split(key)
    w = jax.random.normal(kw, (fan_in, fan_out), jnp.float32) * 0.02
    b = jax.random.normal(kb, (fan_out,), jnp.float32) * 0.02
    return w, b


def make_euda_params(key, *, embed_dim, patch, in_ch, bottleneck_size,
                     num_classes):
    k_in = in_ch * patch * patch
    k_pad = _round_up(k_in, 128)
    n_pad = _round_up(num_classes, 128)
    keys = jax.random.split(key, 24)
    params = {}

    # Backbone surrogate: patch embedding (zero-padded, lane-aligned K) + LN.
    pw, pb = _init_linear(keys[0], k_in, embed_dim)
    params["patch_w"] = jnp.pad(pw, ((0, k_pad - k_in), (0, 0))).astype(jnp.bfloat16)
    params["patch_b"] = pb.reshape(1, embed_dim)
    params["ln_gamma"] = jnp.ones((1, embed_dim), jnp.float32)
    params["ln_beta"] = jnp.zeros((1, embed_dim), jnp.float32)

    # Bottleneck: Linear(embed_dim, max_node) then halve until 256.  The
    # PyTorch nn.Sequential is bare Linear layers (no nonlinearity), so the
    # chain is folded in f32 into a single (embed_dim x 256) affine map.
    layer_dims = []
    prev = _MAXIMUM_LAYER_NODE[bottleneck_size]
    layer_dims.append((embed_dim, prev))
    while prev != 256:
        cur = prev // 2
        layer_dims.append((prev, cur))
        prev = cur
    w_fold = None
    b_fold = None
    for i, (fi, fo) in enumerate(layer_dims):
        w, b = _init_linear(keys[1 + i], fi, fo)
        if w_fold is None:
            w_fold, b_fold = w, b
        else:
            w_fold = w_fold @ w
            b_fold = b_fold @ w + b
    params["bottleneck_w_fold"] = w_fold.astype(jnp.bfloat16)   # [embed_dim, 256]
    params["bottleneck_b_fold"] = b_fold.reshape(1, -1)         # [1, 256] f32

    # Head: Linear(256, num_classes), lane-padded to a multiple of 128.
    hw, hb = _init_linear(keys[20], 256, num_classes)
    params["head_w"] = jnp.pad(hw, ((0, 0), (0, n_pad - num_classes))).astype(jnp.bfloat16)
    params["head_b"] = jnp.pad(hb, (0, n_pad - num_classes)).reshape(1, n_pad)
    return params


def euda_forward(params, x, *, patch, num_classes, return_features_only=False):
    """x: NCHW image [B, C, H, W].  Returns (features, logits) by default."""
    B, C, H, W = x.shape
    ph = pw_ = patch
    gh, gw = H // ph, W // pw_
    P = gh * gw
    K = C * ph * pw_
    Kpad, _ = params["patch_w"].shape
    Bp, block_b = _batch_blocking(B)

    # --- patchify + patch mean-pool in XLA glue (layout only, tiny output) ---
    # The patch-embed conv is affine per patch, so mean over patches commutes
    # with it; the kernel only ever sees the pooled [Bp, Kpad] tensor.
    patches = x.reshape(B, C, gh, ph, gw, pw_)
    patches = jnp.transpose(patches, (0, 2, 4, 1, 3, 5)).reshape(B, P, K)
    xm = jnp.mean(patches, axis=1)                              # [B, K] f32
    xm = jnp.pad(xm, ((0, Bp - B), (0, Kpad - K))).astype(jnp.bfloat16)

    # --- one fused kernel: embed + LN + folded bottleneck + head ---
    # TODO(synk): pretrained DINOv2 transformer blocks are not re-implemented.
    feats_pad, logits_pad = pallas_euda_fused(
        xm,
        params["patch_w"], params["patch_b"],
        params["ln_gamma"], params["ln_beta"],
        params["bottleneck_w_fold"], params["bottleneck_b_fold"],
        params["head_w"], params["head_b"],
        block_b=block_b,
    )

    features = feats_pad[:B]                                    # [B, 256]
    logits = logits_pad[:B, :num_classes]                       # [B, classes]
    if not return_features_only:
        return features, logits
    return logits   # matches the module's quirk: returns head(features)


# ----------------------------------------------------------------------------
# main
# ----------------------------------------------------------------------------
if __name__ == "__main__":
    key = jax.random.PRNGKey(0)
    k_x, k_p = jax.random.split(key)

    # Small, module-consistent shapes:
    #   DINOv2_base: patch=14, embed_dim=768; bottleneck 'base'; 10 classes
    B, C, H, W = 2, 3, 28, 28
    PATCH = 14
    EMBED_DIM = 768
    NUM_CLASSES = 10

    x = jax.random.normal(k_x, (B, C, H, W), jnp.float32)
    params = make_euda_params(
        k_p,
        embed_dim=EMBED_DIM,
        patch=PATCH,
        in_ch=C,
        bottleneck_size="base",
        num_classes=NUM_CLASSES,
    )

    fwd = jax.jit(functools.partial(
        euda_forward, patch=PATCH, num_classes=NUM_CLASSES))
    features, logits = fwd(params, x)
    jax.block_until_ready((features, logits))

    assert features.shape == (B, 256), features.shape
    assert logits.shape == (B, NUM_CLASSES), logits.shape
    assert bool(jnp.all(jnp.isfinite(features))) and bool(jnp.all(jnp.isfinite(logits)))
    print("KERNEL_OK")
</pallas_src>

<mosaic_0001>
module attributes {stable_mosaic.version = 11 : i64} {
  func.func @_euda_fused_kernel(%arg0: i32, %arg1: memref<8x640xbf16, #tpu.memory_space<vmem>>, %arg2: memref<640x768xbf16, #tpu.memory_space<vmem>>, %arg3: memref<1x768xf32, #tpu.memory_space<vmem>>, %arg4: memref<1x768xf32, #tpu.memory_space<vmem>>, %arg5: memref<1x768xf32, #tpu.memory_space<vmem>>, %arg6: memref<768x256xbf16, #tpu.memory_space<vmem>>, %arg7: memref<1x256xf32, #tpu.memory_space<vmem>>, %arg8: memref<256x128xbf16, #tpu.memory_space<vmem>>, %arg9: memref<1x128xf32, #tpu.memory_space<vmem>>, %arg10: memref<8x256xf32, #tpu.memory_space<vmem>>, %arg11: memref<8x128xf32, #tpu.memory_space<vmem>>) attributes {dimension_semantics = [#tpu.dimension_semantics<parallel>], iteration_bounds = array<i64: 1>, scalar_prefetch = 0 : i64, scratch_operands = 0 : i64, tpu.core_type = #tpu.core_type<tc>, window_params = [{transform_indices = @transform_0, window_bounds = array<i64: 8, 640>}, {pipeline_mode = #tpu.pipeline_mode<synchronous>, transform_indices = @transform_1, window_bounds = array<i64: 640, 768>}, {pipeline_mode = #tpu.pipeline_mode<synchronous>, transform_indices = @transform_2, window_bounds = array<i64: 1, 768>}, {pipeline_mode = #tpu.pipeline_mode<synchronous>, transform_indices = @transform_3, window_bounds = array<i64: 1, 768>}, {pipeline_mode = #tpu.pipeline_mode<synchronous>, transform_indices = @transform_4, window_bounds = array<i64: 1, 768>}, {pipeline_mode = #tpu.pipeline_mode<synchronous>, transform_indices = @transform_5, window_bounds = array<i64: 768, 256>}, {pipeline_mode = #tpu.pipeline_mode<synchronous>, transform_indices = @transform_6, window_bounds = array<i64: 1, 256>}, {pipeline_mode = #tpu.pipeline_mode<synchronous>, transform_indices = @transform_7, window_bounds = array<i64: 256, 128>}, {pipeline_mode = #tpu.pipeline_mode<synchronous>, transform_indices = @transform_8, window_bounds = array<i64: 1, 128>}, {transform_indices = @transform_9, window_bounds = array<i64: 8, 256>}, {transform_indices = @transform_10, window_bounds = array<i64: 8, 128>}]} {
    %c0 = arith.constant 0 : index
    %c0_0 = arith.constant 0 : index
    %0 = vector.load %arg1[%c0, %c0_0] : memref<8x640xbf16, #tpu.memory_space<vmem>>, vector<8x640xbf16>
    %c0_1 = arith.constant 0 : index
    %c0_2 = arith.constant 0 : index
    %1 = vector.load %arg2[%c0_1, %c0_2] : memref<640x768xbf16, #tpu.memory_space<vmem>>, vector<640x768xbf16>
    %cst = arith.constant dense<0.000000e+00> : vector<8x768xf32>
    %2 = tpu.matmul %0, %1, %cst {dimension_numbers = #tpu.dot_dimension_numbers<[1], [0], [0], [1], [0, 0, 1, 1], [], []>} : vector<8x640xbf16>, vector<640x768xbf16>, vector<8x768xf32> -> vector<8x768xf32>
    %c0_3 = arith.constant 0 : index
    %c0_4 = arith.constant 0 : index
    %3 = vector.load %arg3[%c0_3, %c0_4] : memref<1x768xf32, #tpu.memory_space<vmem>>, vector<1x768xf32>
    %4 = vector.broadcast %3 : vector<1x768xf32> to vector<8x768xf32>
    %5 = arith.addf %2, %4 : vector<8x768xf32>
    %cst_5 = arith.constant dense<0.000000e+00> : vector<8xf32>
    %6 = vector.multi_reduction <add>, %5, %cst_5 [1] : vector<8x768xf32> to vector<8xf32>
    %7 = vector.shape_cast %6 : vector<8xf32> to vector<8x1xf32>
    %cst_6 = arith.constant 7.680000e+02 : f32
    %8 = vector.broadcast %cst_6 : f32 to vector<8x1xf32>
    %9 = arith.divf %7, %8 : vector<8x1xf32>
    %10 = vector.broadcast %9 : vector<8x1xf32> to vector<8x768xf32>
    %11 = arith.subf %5, %10 : vector<8x768xf32>
    %12 = arith.mulf %11, %11 : vector<8x768xf32>
    %cst_7 = arith.constant dense<0.000000e+00> : vector<8xf32>
    %13 = vector.multi_reduction <add>, %12, %cst_7 [1] : vector<8x768xf32> to vector<8xf32>
    %14 = vector.shape_cast %13 : vector<8xf32> to vector<8x1xf32>
    %cst_8 = arith.constant 7.680000e+02 : f32
    %15 = vector.broadcast %cst_8 : f32 to vector<8x1xf32>
    %16 = arith.divf %14, %15 : vector<8x1xf32>
    %17 = vector.broadcast %9 : vector<8x1xf32> to vector<8x768xf32>
    %18 = arith.subf %5, %17 : vector<8x768xf32>
    %cst_9 = arith.constant 9.99999997E-7 : f32
    %19 = vector.broadcast %cst_9 : f32 to vector<8x1xf32>
    %20 = arith.addf %16, %19 : vector<8x1xf32>
    %21 = math.rsqrt %20 : vector<8x1xf32>
    %22 = vector.broadcast %21 : vector<8x1xf32> to vector<8x768xf32>
    %23 = arith.mulf %18, %22 : vector<8x768xf32>
    %c0_10 = arith.constant 0 : index
    %c0_11 = arith.constant 0 : index
    %24 = vector.load %arg4[%c0_10, %c0_11] : memref<1x768xf32, #tpu.memory_space<vmem>>, vector<1x768xf32>
    %25 = vector.broadcast %24 : vector<1x768xf32> to vector<8x768xf32>
    %26 = arith.mulf %23, %25 : vector<8x768xf32>
    %c0_12 = arith.constant 0 : index
    %c0_13 = arith.constant 0 : index
    %27 = vector.load %arg5[%c0_12, %c0_13] : memref<1x768xf32, #tpu.memory_space<vmem>>, vector<1x768xf32>
    %28 = vector.broadcast %27 : vector<1x768xf32> to vector<8x768xf32>
    %29 = arith.addf %26, %28 : vector<8x768xf32>
    %30 = arith.truncf %29 : vector<8x768xf32> to vector<8x768xbf16>
    %c0_14 = arith.constant 0 : index
    %c0_15 = arith.constant 0 : index
    %31 = vector.load %arg6[%c0_14, %c0_15] : memref<768x256xbf16, #tpu.memory_space<vmem>>, vector<768x256xbf16>
    %cst_16 = arith.constant dense<0.000000e+00> : vector<8x256xf32>
    %32 = tpu.matmul %30, %31, %cst_16 {dimension_numbers = #tpu.dot_dimension_numbers<[1], [0], [0], [1], [0, 0, 1, 1], [], []>} : vector<8x768xbf16>, vector<768x256xbf16>, vector<8x256xf32> -> vector<8x256xf32>
    %c0_17 = arith.constant 0 : index
    %c0_18 = arith.constant 0 : index
    %33 = vector.load %arg7[%c0_17, %c0_18] : memref<1x256xf32, #tpu.memory_space<vmem>>, vector<1x256xf32>
    %34 = vector.broadcast %33 : vector<1x256xf32> to vector<8x256xf32>
    %35 = arith.addf %32, %34 : vector<8x256xf32>
    %c0_19 = arith.constant 0 : index
    %c0_20 = arith.constant 0 : index
    %36 = vector.load %arg10[%c0_19, %c0_20] : memref<8x256xf32, #tpu.memory_space<vmem>>, vector<8x256xf32>
    tpu.vector_store %arg10[%c0_19, %c0_20], %35 {strides = array<i32>} : memref<8x256xf32, #tpu.memory_space<vmem>>, vector<8x256xf32>,
    %37 = arith.truncf %35 : vector<8x256xf32> to vector<8x256xbf16>
    %c0_21 = arith.constant 0 : index
    %c0_22 = arith.constant 0 : index
    %38 = vector.load %arg8[%c0_21, %c0_22] : memref<256x128xbf16, #tpu.memory_space<vmem>>, vector<256x128xbf16>
    %cst_23 = arith.constant dense<0.000000e+00> : vector<8x128xf32>
    %39 = tpu.matmul %37, %38, %cst_23 {dimension_numbers = #tpu.dot_dimension_numbers<[1], [0], [0], [1], [0, 0, 1, 1], [], []>} : vector<8x256xbf16>, vector<256x128xbf16>, vector<8x128xf32> -> vector<8x128xf32>
    %c0_24 = arith.constant 0 : index
    %c0_25 = arith.constant 0 : index
    %40 = vector.load %arg9[%c0_24, %c0_25] : memref<1x128xf32, #tpu.memory_space<vmem>>, vector<1x128xf32>
    %41 = vector.broadcast %40 : vector<1x128xf32> to vector<8x128xf32>
    %42 = arith.addf %39, %41 : vector<8x128xf32>
    %c0_26 = arith.constant 0 : index
    %c0_27 = arith.constant 0 : index
    %43 = vector.load %arg11[%c0_26, %c0_27] : memref<8x128xf32, #tpu.memory_space<vmem>>, vector<8x128xf32>
    tpu.vector_store %arg11[%c0_26, %c0_27], %42 {strides = array<i32>} : memref<8x128xf32, #tpu.memory_space<vmem>>, vector<8x128xf32>,
    return
  }
  func.func @transform_0(%arg0: i32) -> (i32, i32) {
    %c0_i32 = arith.constant 0 : i32
    %c0_i32_0 = arith.constant 0 : i32
    return %arg0, %c0_i32 : i32, i32
  }
  func.func @transform_1(%arg0: i32) -> (i32, i32) {
    %c0_i32 = arith.constant 0 : i32
    %c0_i32_0 = arith.constant 0 : i32
    %c0_i32_1 = arith.constant 0 : i32
    return %c0_i32, %c0_i32_0 : i32, i32
  }
  func.func @transform_2(%arg0: i32) -> (i32, i32) {
    %c0_i32 = arith.constant 0 : i32
    %c0_i32_0 = arith.constant 0 : i32
    %c0_i32_1 = arith.constant 0 : i32
    return %c0_i32, %c0_i32_0 : i32, i32
  }
  func.func @transform_3(%arg0: i32) -> (i32, i32) {
    %c0_i32 = arith.constant 0 : i32
    %c0_i32_0 = arith.constant 0 : i32
    %c0_i32_1 = arith.constant 0 : i32
    return %c0_i32, %c0_i32_0 : i32, i32
  }
  func.func @transform_4(%arg0: i32) -> (i32, i32) {
    %c0_i32 = arith.constant 0 : i32
    %c0_i32_0 = arith.constant 0 : i32
    %c0_i32_1 = arith.constant 0 : i32
    return %c0_i32, %c0_i32_0 : i32, i32
  }
  func.func @transform_5(%arg0: i32) -> (i32, i32) {
    %c0_i32 = arith.constant 0 : i32
    %c0_i32_0 = arith.constant 0 : i32
    %c0_i32_1 = arith.constant 0 : i32
    return %c0_i32, %c0_i32_0 : i32, i32
  }
  func.func @transform_6(%arg0: i32) -> (i32, i32) {
    %c0_i32 = arith.constant 0 : i32
    %c0_i32_0 = arith.constant 0 : i32
    %c0_i32_1 = arith.constant 0 : i32
    return %c0_i32, %c0_i32_0 : i32, i32
  }
  func.func @transform_7(%arg0: i32) -> (i32, i32) {
    %c0_i32 = arith.constant 0 : i32
    %c0_i32_0 = arith.constant 0 : i32
    %c0_i32_1 = arith.constant 0 : i32
    return %c0_i32, %c0_i32_0 : i32, i32
  }
  func.func @transform_8(%arg0: i32) -> (i32, i32) {
    %c0_i32 = arith.constant 0 : i32
    %c0_i32_0 = arith.constant 0 : i32
    %c0_i32_1 = arith.constant 0 : i32
    return %c0_i32, %c0_i32_0 : i32, i32
  }
  func.func @transform_9(%arg0: i32) -> (i32, i32) {
    %c0_i32 = arith.constant 0 : i32
    %c0_i32_0 = arith.constant 0 : i32
    return %arg0, %c0_i32 : i32, i32
  }
  func.func @transform_10(%arg0: i32) -> (i32, i32) {
    %c0_i32 = arith.constant 0 : i32
    %c0_i32_0 = arith.constant 0 : i32
    return %arg0, %c0_i32 : i32, i32
  }
}

</mosaic_0001>

<bundles_post_ra>
// kernel: euda_forward.1
= control target key start
LH: loop header
LB: loop body
LE: loop exit
PB: predicated region body
PF: predicated region fallthrough
CT: control target
= control target key end

     0   :  { %16 = vsyncpa [#allocation3], 0  ;;  %s4718_s16 = smov [#allocation2]   ;;  %s4719_s18 = smov 384   ;;  %s5593_s0 = inlined_call_operand.vmem [shape: bf16[8,640], index: 0, kind: input, shape index: {}]   ;;  %s5594_s1 = inlined_call_operand.hbm [shape: bf16[640,768], index: 1, kind: input, shape index: {}]   ;;  %s5595_s2 = inlined_call_operand.vmem [shape: f32[1,768], index: 2, kind: input, shape index: {}]   ;;  %s5596_s3 = inlined_call_operand.vmem [shape: f32[1,768], index: 3, kind: input, shape index: {}]   ;;  %s5597_s4 = inlined_call_operand.vmem [shape: f32[1,768], index: 4, kind: input, shape index: {}]   ;;  %s5598_s5 = inlined_call_operand.vmem [shape: bf16[768,256], index: 5, kind: input, shape index: {}]   ;;  %s5599_s6 = inlined_call_operand.vmem [shape: f32[1,256], index: 6, kind: input, shape index: {}]   ;;  %s5600_s7 = inlined_call_operand.vmem [shape: bf16[256,128], index: 7, kind: input, shape index: {}]   ;;  %s5601_s8 = inlined_call_operand.vmem [shape: f32[1,128], index: 8, kind: input, shape index: {}]   ;;  %s5602_s9 = inlined_call_operand.vmem [shape: f32[8,256], index: 9, kind: output, shape index: {0}]   ;;  %s5603_s10 = inlined_call_operand.vmem [shape: f32[8,128], index: 10, kind: output, shape index: {1}]  }
   0x1   :  { %s23_s15 = sshll.u32 %s5594_s1, 4  ;;  %s25_s17 = sshll.u32 %s4718_s16, 4  ;;  %s24_s15 = int_to_ptr.hbm [resolvable:$true] %s23_s15  ;;  %s26_s17 = int_to_ptr.vmem [resolvable:$true] %s25_s17 }
   0x2   :  { %s4720_s19 = smov 24  }
   0x3   :  { %31 = dma.hbm_to_vmem [thread:$0]  %s24_s15, 30720, %s26_s17, [#allocation3], %s4719_s18, %s4719_s18, %s4720_s19  }
   0x4   :  { %4716 = dma.done.wait [#allocation3], 30720  }
   0x5   :  { %4717 = vsyncadd [#allocation3], 4294936576  ;;  %v3093_v0 = vld [vmem:[#allocation2 + $0x150] sm:$0xf]  ;;  %v4376_v1 = vld [vmem:[#allocation2 + $0x164] sm:$0xf0] }
   0x6   :  { %v3285_v2 = vld [vmem:[#allocation2 + $0x2d0] sm:$0xf]  ;;  %v3094_v3 = vor.u32 %v4376_v1, %v3093_v0  ;;  %v4424_v4 = vld [vmem:[#allocation2 + $0x2e4] sm:$0xf0]  ;;  %v3069_v11 = vld [vmem:[#allocation2 + $0x120] sm:$0xf] }
   0x7   :  { %v3477_v5 = vld [vmem:[#allocation2 + $0x450] sm:$0xf]  ;;  %v4472_v6 = vld [vmem:[#allocation2 + $0x464] sm:$0xf0]  ;;  %v3286_v7 = vor.u32 %v4424_v4, %v3285_v2  ;;  %v4370_v13 = vld [vmem:[#allocation2 + $0x134] sm:$0xf0] }
   0x8   :  { %v3478_v8 = vor.u32 %v4472_v6, %v3477_v5  ;;  %v3669_v9 = vld [vmem:[#allocation2 + $0x5d0] sm:$0xf]  ;;  %v4520_v10 = vld [vmem:[#allocation2 + $0x5e4] sm:$0xf0]  ;;  %1525 = vmatpush.bf16.msra.mxu0 %v3094_v3  ;;  %v3261_v14 = vld [vmem:[#allocation2 + $0x2a0] sm:$0xf]  ;;  %v3070_v16 = vor.u32 %v4370_v13, %v3069_v11 }
   0x9   :  { %v3670_v12 = vor.u32 %v4520_v10, %v3669_v9  ;;  %v4418_v15 = vld [vmem:[#allocation2 + $0x2b4] sm:$0xf0]  ;;  %1538 = vmatpush.bf16.msra.mxu1 %v3286_v7  ;;  %v3453_v18 = vld [vmem:[#allocation2 + $0x420] sm:$0xf]  ;;  %v3045_v23 = vld [vmem:[#allocation2 + $0xf0] sm:$0xf] }
   0xa   :  { %1551 = vmatpush.bf16.msra.mxu2 %v3478_v8  ;;  %v3262_v17 = vor.u32 %v4418_v15, %v3261_v14  ;;  %v4466_v19 = vld [vmem:[#allocation2 + $0x434] sm:$0xf0]  ;;  %v3645_v20 = vld [vmem:[#allocation2 + $0x5a0] sm:$0xf]  ;;  %v4364_v24 = vld [vmem:[#allocation2 + $0x104] sm:$0xf0] }
   0xb   :  { %1564 = vmatpush.bf16.msra.mxu3 %v3670_v12  ;;  %v3454_v21 = vor.u32 %v4466_v19, %v3453_v18  ;;  %v4514_v22 = vld [vmem:[#allocation2 + $0x5b4] sm:$0xf0]  ;;  %v3237_v26 = vld [vmem:[#allocation2 + $0x270] sm:$0xf]  ;;  %v4412_v27 = vld [vmem:[#allocation2 + $0x284] sm:$0xf0]  ;;  %v3046_v29 = vor.u32 %v4364_v24, %v3045_v23 }
   0xc   :  { %v3646_v25 = vor.u32 %v4514_v22, %v3645_v20  ;;  %v3429_v28 = vld [vmem:[#allocation2 + $0x3f0] sm:$0xf]  ;;  %1526 = vmatpush.bf16.msra.mxu0 %v3070_v16  ;;  %v4460_v30 = vld [vmem:[#allocation2 + $0x404] sm:$0xf0]  ;;  %v3238_v33 = vor.u32 %v4412_v27, %v3237_v26  ;;  %v3021_v35 = vld [vmem:[#allocation2 + $0xc0] sm:$0xf] }
   0xd   :  { %v3621_v31 = vld [vmem:[#allocation2 + $0x570] sm:$0xf]  ;;  %v4508_v32 = vld [vmem:[#allocation2 + $0x584] sm:$0xf0]  ;;  %1539 = vmatpush.bf16.msra.mxu1 %v3262_v17  ;;  %v3430_v34 = vor.u32 %v4460_v30, %v3429_v28  ;;  %v4358_v36 = vld [vmem:[#allocation2 + $0xd4] sm:$0xf0] }
   0xe   :  { %1552 = vmatpush.bf16.msra.mxu2 %v3454_v21  ;;  %v3213_v37 = vld [vmem:[#allocation2 + $0x240] sm:$0xf]  ;;  %v3622_v38 = vor.u32 %v4508_v32, %v3621_v31  ;;  %v4406_v39 = vld [vmem:[#allocation2 + $0x254] sm:$0xf0]  ;;  %v3022_v44 = vor.u32 %v4358_v36, %v3021_v35  ;;  %v2997_v47 = vld [vmem:[#allocation2 + $0x90] sm:$0xf] }
   0xf   :  { %1565 = vmatpush.bf16.msra.mxu3 %v3646_v25  ;;  %v3405_v40 = vld [vmem:[#allocation2 + $0x3c0] sm:$0xf]  ;;  %v4454_v41 = vld [vmem:[#allocation2 + $0x3d4] sm:$0xf0]  ;;  %v3214_v45 = vor.u32 %v4406_v39, %v3213_v37  ;;  %v4352_v48 = vld [vmem:[#allocation2 + $0xa4] sm:$0xf0] }
  0x10   :  { %v3597_v42 = vld [vmem:[#allocation2 + $0x540] sm:$0xf]  ;;  %v4502_v43 = vld [vmem:[#allocation2 + $0x554] sm:$0xf0]  ;;  %1527 = vmatpush.bf16.msra.mxu0 %v3046_v29  ;;  %v3406_v46 = vor.u32 %v4454_v41, %v3405_v40  ;;  %v3189_v49 = vld [vmem:[#allocation2 + $0x210] sm:$0xf]  ;;  %v2998_v56 = vor.u32 %v4352_v48, %v2997_v47 }
  0x11   :  { %1540 = vmatpush.bf16.msra.mxu1 %v3238_v33  ;;  %v3598_v50 = vor.u32 %v4502_v43, %v3597_v42  ;;  %v4400_v51 = vld [vmem:[#allocation2 + $0x224] sm:$0xf0]  ;;  %v3381_v52 = vld [vmem:[#allocation2 + $0x390] sm:$0xf]  ;;  %v2973_v59 = vld [vmem:[#allocation2 + $0x60] sm:$0xf] }
  0x12   :  { %1553 = vmatpush.bf16.msra.mxu2 %v3430_v34  ;;  %v4448_v53 = vld [vmem:[#allocation2 + $0x3a4] sm:$0xf0]  ;;  %v3573_v54 = vld [vmem:[#allocation2 + $0x510] sm:$0xf]  ;;  %v3190_v57 = vor.u32 %v4400_v51, %v3189_v49  ;;  %v4346_v60 = vld [vmem:[#allocation2 + $0x74] sm:$0xf0] }
  0x13   :  { %1566 = vmatpush.bf16.msra.mxu3 %v3622_v38  ;;  %v4496_v55 = vld [vmem:[#allocation2 + $0x524] sm:$0xf0]  ;;  %v3382_v58 = vor.u32 %v4448_v53, %v3381_v52  ;;  %v3165_v61 = vld [vmem:[#allocation2 + $0x1e0] sm:$0xf]  ;;  %v4394_v63 = vld [vmem:[#allocation2 + $0x1f4] sm:$0xf0]  ;;  %v2974_v4 = vor.u32 %v4346_v60, %v2973_v59 }
  0x14   :  { %1528 = vmatpush.bf16.msra.mxu0 %v3022_v44  ;;  %v3574_v62 = vor.u32 %v4496_v55, %v3573_v54  ;;  %v3357_v0 = vld [vmem:[#allocation2 + $0x360] sm:$0xf]  ;;  %v4442_v1 = vld [vmem:[#allocation2 + $0x374] sm:$0xf0]  ;;  %v3166_v5 = vor.u32 %v4394_v63, %v3165_v61  ;;  %v2949_v7 = vld [vmem:[#allocation2 + $0x30] sm:$0xf] }
  0x15   :  { %1541 = vmatpush.bf16.msra.mxu1 %v3214_v45  ;;  %v3549_v2 = vld [vmem:[#allocation2 + $0x4e0] sm:$0xf]  ;;  %v4490_v3 = vld [vmem:[#allocation2 + $0x4f4] sm:$0xf0]  ;;  %v3358_v6 = vor.u32 %v4442_v1, %v3357_v0  ;;  %v4340_v8 = vld [vmem:[#allocation2 + $0x44] sm:$0xf0] }
  0x16   :  { %1554 = vmatpush.bf16.msra.mxu2 %v3406_v46  ;;  %v3141_v9 = vld [vmem:[#allocation2 + $0x1b0] sm:$0xf]  ;;  %v3550_v10 = vor.u32 %v4490_v3, %v3549_v2  ;;  %v4388_v11 = vld [vmem:[#allocation2 + $0x1c4] sm:$0xf0]  ;;  %v2950_v16 = vor.u32 %v4340_v8, %v2949_v7  ;;  %v2925_v17 = vld [vmem:[#allocation2] sm:$0xf] }
  0x17   :  { %1567 = vmatpush.bf16.msra.mxu3 %v3598_v50  ;;  %v3333_v12 = vld [vmem:[#allocation2 + $0x330] sm:$0xf]  ;;  %v4436_v13 = vld [vmem:[#allocation2 + $0x344] sm:$0xf0]  ;;  %v4334_v18 = vld [vmem:[#allocation2 + $0x14] sm:$0xf0]  ;;  %v3142_v19 = vor.u32 %v4388_v11, %v3141_v9 }
  0x18   :  { %1529 = vmatpush.bf16.msra.mxu0 %v2998_v56  ;;  %v3525_v14 = vld [vmem:[#allocation2 + $0x4b0] sm:$0xf]  ;;  %v4484_v15 = vld [vmem:[#allocation2 + $0x4c4] sm:$0xf0]  ;;  %v3334_v20 = vor.u32 %v4436_v13, %v3333_v12  ;;  %v3117_v21 = vld [vmem:[#allocation2 + $0x180] sm:$0xf]  ;;  %v2926_v31 = vor.u32 %v4334_v18, %v2925_v17 }
  0x19   :  { %1542 = vmatpush.bf16.msra.mxu1 %v3190_v57  ;;  %v4382_v22 = vld [vmem:[#allocation2 + $0x194] sm:$0xf0]  ;;  %v3309_v23 = vld [vmem:[#allocation2 + $0x300] sm:$0xf]  ;;  %v3526_v24 = vor.u32 %v4484_v15, %v3525_v14  ;;  %v3861_v26 = vld [vmem:[#allocation2 + $0x750] sm:$0xf] }
  0x1a   :  { %1555 = vmatpush.bf16.msra.mxu2 %v3382_v58  ;;  %v4430_v25 = vld [vmem:[#allocation2 + $0x314] sm:$0xf0]  ;;  %v4568_v27 = vld [vmem:[#allocation2 + $0x764] sm:$0xf0]  ;;  %v4373_v28 = vld [vmem:[#allocation2 + $0x154] sm:$0xf]  ;;  %v3118_v35 = vor.u32 %v4382_v22, %v3117_v21 }
  0x1b   :  { %1568 = vmatpush.bf16.msra.mxu3 %v3574_v62  ;;  %v3095_v29 = vld [vmem:[#allocation2 + $0x168] sm:$0xf0]  ;;  %v4421_v30 = vld [vmem:[#allocation2 + $0x2d4] sm:$0xf]  ;;  %v3501_v33 = vld [vmem:[#allocation2 + $0x480] sm:$0xf]  ;;  %v3310_v36 = vor.u32 %v4430_v25, %v3309_v23  ;;  %v3862_v39 = vor.u32 %v4568_v27, %v3861_v26 }
  0x1c   :  { %1530 = vmatpush.bf16.msra.mxu0 %v2974_v4  ;;  %v3287_v32 = vld [vmem:[#allocation2 + $0x2e8] sm:$0xf0]  ;;  %v4478_v34 = vld [vmem:[#allocation2 + $0x494] sm:$0xf0]  ;;  %v4469_v37 = vld [vmem:[#allocation2 + $0x454] sm:$0xf]  ;;  %v3098_v40 = vor.u32 %v4373_v28, %v3095_v29 }
  0x1d   :  { %1543 = vmatpush.bf16.msra.mxu1 %v3166_v5  ;;  %v3479_v38 = vld [vmem:[#allocation2 + $0x468] sm:$0xf0]  ;;  %v3837_v41 = vld [vmem:[#allocation2 + $0x720] sm:$0xf]  ;;  %v3290_v42 = vor.u32 %v4421_v30, %v3287_v32  ;;  %v3502_v43 = vor.u32 %v4478_v34, %v3501_v33  ;;  %v4562_v44 = vld [vmem:[#allocation2 + $0x734] sm:$0xf0] }
  0x1e   :  { %1556 = vmatpush.bf16.msra.mxu2 %v3358_v6  ;;  %v4367_v45 = vld [vmem:[#allocation2 + $0x124] sm:$0xf]  ;;  %v3071_v46 = vld [vmem:[#allocation2 + $0x138] sm:$0xf0]  ;;  %v3482_v47 = vor.u32 %v4469_v37, %v3479_v38  ;;  %v3838_v52 = vor.u32 %v4562_v44, %v3837_v41  ;;  %v3813_v54 = vld [vmem:[#allocation2 + $0x6f0] sm:$0xf] }
  0x1f   :  { %1569 = vmatpush.bf16.msra.mxu3 %v3550_v10  ;;  %v4415_v48 = vld [vmem:[#allocation2 + $0x2a4] sm:$0xf]  ;;  %v3263_v49 = vld [vmem:[#allocation2 + $0x2b8] sm:$0xf0]  ;;  %v3074_v53 = vor.u32 %v4367_v45, %v3071_v46  ;;  %v4556_v56 = vld [vmem:[#allocation2 + $0x704] sm:$0xf0] }
  0x20   :  { %1531 = vmatpush.bf16.msra.mxu0 %v2950_v16  ;;  %v4463_v50 = vld [vmem:[#allocation2 + $0x424] sm:$0xf]  ;;  %v3455_v51 = vld [vmem:[#allocation2 + $0x438] sm:$0xf0]  ;;  %v3266_v55 = vor.u32 %v4415_v48, %v3263_v49  ;;  %v4361_v57 = vld [vmem:[#allocation2 + $0xf4] sm:$0xf]  ;;  %v3814_v1 = vor.u32 %v4556_v56, %v3813_v54 }
  0x21   :  { %1544 = vmatpush.bf16.msra.mxu1 %v3142_v19  ;;  %v3047_v58 = vld [vmem:[#allocation2 + $0x108] sm:$0xf0]  ;;  %v3458_v59 = vor.u32 %v4463_v50, %v3455_v51  ;;  %v4409_v60 = vld [vmem:[#allocation2 + $0x274] sm:$0xf]  ;;  %v50_v0 = vld [vmem:[%s5593_s0] sm:$0xff] }
  0x22   :  { %1557 = vmatpush.bf16.msra.mxu2 %v3334_v20  ;;  %v3239_v61 = vld [vmem:[#allocation2 + $0x288] sm:$0xf0]  ;;  %v4457_v62 = vld [vmem:[#allocation2 + $0x3f4] sm:$0xf]  ;;  %v3050_v2 = vor.u32 %v4361_v57, %v3047_v58  ;;  %v3789_v3 = vld [vmem:[#allocation2 + $0x6c0] sm:$0xf]  ;;  %v310_v4 = vunpack.c.l.b16 %v50_v0  ;;  %v311_v5 = vunpack.c.h.b16 %v50_v0 }
  0x23   :  { %1570 = vmatpush.bf16.msra.mxu3 %v3526_v24  ;;  %v3431_v63 = vld [vmem:[#allocation2 + $0x408] sm:$0xf0]  ;;  %v3242_v6 = vor.u32 %v4409_v60, %v3239_v61  ;;  %v4550_v7 = vld [vmem:[#allocation2 + $0x6d4] sm:$0xf0]  ;;  %v4355_v8 = vld [vmem:[#allocation2 + $0xc4] sm:$0xf] }
  0x24   :  { %1532 = vmatpush.bf16.msra.mxu0 %v2926_v31  ;;  %v3023_v9 = vld [vmem:[#allocation2 + $0xd8] sm:$0xf0]  ;;  %v3434_v10 = vor.u32 %v4457_v62, %v3431_v63  ;;  %v4403_v11 = vld [vmem:[#allocation2 + $0x244] sm:$0xf]  ;;  %v4783_v13 = vpack.c.b16 %v310_v4, %v310_v4  ;;  %v4785_v14 = vpack.c.b16 %v311_v5, %v311_v5  ;;  %v51_v17 = vld [vmem:[%s5593_s0 + $0x8] sm:$0xff]  ;;  %v3790_v18 = vor.u32 %v4550_v7, %v3789_v3 }
  0x25   :  { %1545 = vmatpush.bf16.msra.mxu1 %v3118_v35  ;;  %v3215_v12 = vld [vmem:[#allocation2 + $0x258] sm:$0xf0]  ;;  %v4451_v15 = vld [vmem:[#allocation2 + $0x3c4] sm:$0xf]  ;;  %v3026_v19 = vor.u32 %v4355_v8, %v3023_v9  ;;  %v3765_v20 = vld [vmem:[#allocation2 + $0x690] sm:$0xf]  ;;  %v312_v21 = vunpack.c.l.b16 %v51_v17  ;;  %v313_v22 = vunpack.c.h.b16 %v51_v17 }
  0x26   :  { %1558 = vmatpush.bf16.msra.mxu2 %v3310_v36  ;;  %v3407_v16 = vld [vmem:[#allocation2 + $0x3d8] sm:$0xf0]  ;;  %v3218_v23 = vor.u32 %v4403_v11, %v3215_v12  ;;  %v4544_v24 = vld [vmem:[#allocation2 + $0x6a4] sm:$0xf0]  ;;  %v4349_v25 = vld [vmem:[#allocation2 + $0x94] sm:$0xf] }
  0x27   :  { %1571 = vmatpush.bf16.msra.mxu3 %v3502_v43  ;;  %v2999_v26 = vld [vmem:[#allocation2 + $0xa8] sm:$0xf0]  ;;  %1533 = vmatmul.bf16.vlgmr.msra.gmra.mxu0 %v4783_v13  ;;  %v3410_v27 = vor.u32 %v4451_v15, %v3407_v16  ;;  %v4397_v28 = vld [vmem:[#allocation2 + $0x214] sm:$0xf]  ;;  %v4792_v30 = vpack.c.b16 %v312_v21, %v312_v21  ;;  %v4794_v31 = vpack.c.b16 %v313_v22, %v313_v22  ;;  %v3741_v36 = vld [vmem:[#allocation2 + $0x660] sm:$0xf] }
  0x28   :  { %1577 = vmatpush.bf16.msrb.mxu0 %v3862_v39  ;;  %v3191_v29 = vld [vmem:[#allocation2 + $0x228] sm:$0xf0]  ;;  %1546 = vmatmul.bf16.vlgmr.msra.gmra.mxu1 %v4785_v14  ;;  %v4445_v32 = vld [vmem:[#allocation2 + $0x394] sm:$0xf]  ;;  %v3766_v34 = vor.u32 %v4544_v24, %v3765_v20  ;;  %v3002_v35 = vor.u32 %v4349_v25, %v2999_v26  ;;  %v4538_v38 = vld [vmem:[#allocation2 + $0x674] sm:$0xf0] }
  0x29   :  { %1590 = vmatpush.bf16.msrb.mxu1 %v3098_v40  ;;  %v3383_v33 = vld [vmem:[#allocation2 + $0x3a8] sm:$0xf0]  ;;  %v3194_v37 = vor.u32 %v4397_v28, %v3191_v29  ;;  %v4343_v39 = vld [vmem:[#allocation2 + $0x64] sm:$0xf]  ;;  %v2975_v40 = vld [vmem:[#allocation2 + $0x78] sm:$0xf0]  ;;  %1559 = vmatmul.bf16.vlgmr.msra.gmra.mxu2 %v4792_v30  ;;  %v3742_v46 = vor.u32 %v4538_v38, %v3741_v36 }
  0x2a   :  { %1603 = vmatpush.bf16.msrb.mxu2 %v3290_v42  ;;  %1572 = vmatmul.bf16.vlgmr.msra.gmra.mxu3 %v4794_v31  ;;  %v3386_v41 = vor.u32 %v4445_v32, %v3383_v33  ;;  %v4391_v42 = vld [vmem:[#allocation2 + $0x1e4] sm:$0xf]  ;;  %v3167_v43 = vld [vmem:[#allocation2 + $0x1f8] sm:$0xf0]  ;;  %v3717_v48 = vld [vmem:[#allocation2 + $0x630] sm:$0xf] }
  0x2b   :  { %1616 = vmatpush.bf16.msrb.mxu3 %v3482_v47  ;;  %v4439_v44 = vld [vmem:[#allocation2 + $0x364] sm:$0xf]  ;;  %v3359_v45 = vld [vmem:[#allocation2 + $0x378] sm:$0xf0]  ;;  %v2978_v47 = vor.u32 %v4343_v39, %v2975_v40  ;;  %v3170_v49 = vor.u32 %v4391_v42, %v3167_v43  ;;  %v4532_v50 = vld [vmem:[#allocation2 + $0x644] sm:$0xf0] }
  0x2c   :  { %1578 = vmatpush.bf16.msrb.mxu0 %v3838_v52  ;;  %v4337_v51 = vld [vmem:[#allocation2 + $0x34] sm:$0xf]  ;;  %v2951_v52 = vld [vmem:[#allocation2 + $0x48] sm:$0xf0]  ;;  %v3693_v58 = vld [vmem:[#allocation2 + $0x600] sm:$0xf] }
  0x2d   :  { %1591 = vmatpush.bf16.msrb.mxu1 %v3074_v53  ;;  %v3362_v53 = vor.u32 %v4439_v44, %v3359_v45  ;;  %v4385_v54 = vld [vmem:[#allocation2 + $0x1b4] sm:$0xf]  ;;  %v3335_v57 = vld [vmem:[#allocation2 + $0x348] sm:$0xf0]  ;;  %v2954_v60 = vor.u32 %v4337_v51, %v2951_v52  ;;  %v4526_v61 = vld [vmem:[#allocation2 + $0x614] sm:$0xf0] }
  0x2e   :  { %1604 = vmatpush.bf16.msrb.mxu2 %v3266_v55  ;;  %v3143_v55 = vld [vmem:[#allocation2 + $0x1c8] sm:$0xf0]  ;;  %v4433_v56 = vld [vmem:[#allocation2 + $0x334] sm:$0xf]  ;;  %v4331_v62 = vld [vmem:[#allocation2 + $0x4] sm:$0xf]  ;;  %v3694_v12 = vor.u32 %v4526_v61, %v3693_v58 }
  0x2f   :  { %1617 = vmatpush.bf16.msrb.mxu3 %v3458_v59  ;;  %v3718_v59 = vor.u32 %v4532_v50, %v3717_v48  ;;  %v52_v63 = vld [vmem:[%s5593_s0 + $0x10] sm:$0xf]  ;;  %v3146_v0 = vor.u32 %v4385_v54, %v3143_v55  ;;  %v3119_v3 = vld [vmem:[#allocation2 + $0x198] sm:$0xf0]  ;;  %v3338_v4 = vor.u32 %v4433_v56, %v3335_v57  ;;  %v4517_v5 = vld [vmem:[#allocation2 + $0x5d4] sm:$0xf] }
  0x30   :  { %1579 = vmatpush.bf16.msrb.mxu0 %v3814_v1  ;;  %v2927_v1 = vld [vmem:[#allocation2 + $0x18] sm:$0xf0]  ;;  %v4565_v7 = vld [vmem:[#allocation2 + $0x754] sm:$0xf]  ;;  %v3863_v8 = vld [vmem:[#allocation2 + $0x768] sm:$0xf0]  ;;  %v314_v11 = vunpack.c.l.b16 %v52_v63 }
  0x31   :  { %1592 = vmatpush.bf16.msrb.mxu1 %v3050_v2  ;;  %v4379_v2 = vld [vmem:[#allocation2 + $0x184] sm:$0xf]  ;;  %v3101_v9 = vld [vmem:[#allocation2 + $0x158] sm:$0xf]  ;;  %v2930_v15 = vor.u32 %v4331_v62, %v2927_v1  ;;  %v3311_v17 = vld [vmem:[#allocation2 + $0x318] sm:$0xf0]  ;;  %v3866_v22 = vor.u32 %v4565_v7, %v3863_v8 }
  0x32   :  { %1605 = vmatpush.bf16.msrb.mxu2 %v3242_v6  ;;  %v3671_v6 = vld [vmem:[#allocation2 + $0x5e8] sm:$0xf0]  ;;  %v4427_v16 = vld [vmem:[#allocation2 + $0x304] sm:$0xf]  ;;  %v3293_v20 = vld [vmem:[#allocation2 + $0x2d8] sm:$0xf]  ;;  %v4801_v33 = vpack.c.b16 %v314_v11, %v314_v11 }
  0x33   :  { %1618 = vmatpush.bf16.msrb.mxu3 %v3434_v10  ;;  %v4377_v10 = vld [vmem:[#allocation2 + $0x16c] sm:$0xf0]  ;;  %v4511_v24 = vld [vmem:[#allocation2 + $0x5a4] sm:$0xf]  ;;  %v3647_v25 = vld [vmem:[#allocation2 + $0x5b8] sm:$0xf0] }
  0x34   :  { %1580 = vmatpush.bf16.msrb.mxu0 %v3790_v18  ;;  %v3122_v18 = vor.u32 %v4379_v2, %v3119_v3  ;;  %v4425_v21 = vld [vmem:[#allocation2 + $0x2ec] sm:$0xf0]  ;;  %v4559_v26 = vld [vmem:[#allocation2 + $0x724] sm:$0xf]  ;;  %v3839_v28 = vld [vmem:[#allocation2 + $0x738] sm:$0xf0] }
  0x35   :  { %1593 = vmatpush.bf16.msrb.mxu1 %v3026_v19  ;;  %v3674_v19 = vor.u32 %v4517_v5, %v3671_v6  ;;  %v3077_v29 = vld [vmem:[#allocation2 + $0x128] sm:$0xf]  ;;  %v4371_v32 = vld [vmem:[#allocation2 + $0x13c] sm:$0xf0]  ;;  %v3842_v38 = vor.u32 %v4559_v26, %v3839_v28  ;;  %v4505_v40 = vld [vmem:[#allocation2 + $0x574] sm:$0xf] }
  0x36   :  { %1606 = vmatpush.bf16.msrb.mxu2 %v3218_v23  ;;  %v3102_v23 = vor.u32 %v4377_v10, %v3101_v9  ;;  %v3269_v36 = vld [vmem:[#allocation2 + $0x2a8] sm:$0xf]  ;;  %v3078_v39 = vor.u32 %v4371_v32, %v3077_v29  ;;  %v4553_v42 = vld [vmem:[#allocation2 + $0x6f4] sm:$0xf]  ;;  %v3815_v43 = vld [vmem:[#allocation2 + $0x708] sm:$0xf0] }
  0x37   :  { %1619 = vmatpush.bf16.msrb.mxu3 %v3410_v27  ;;  %v3314_v27 = vor.u32 %v4427_v16, %v3311_v17  ;;  %v3053_v44 = vld [vmem:[#allocation2 + $0xf8] sm:$0xf]  ;;  %v4365_v45 = vld [vmem:[#allocation2 + $0x10c] sm:$0xf0]  ;;  %v3818_v50 = vor.u32 %v4553_v42, %v3815_v43  ;;  %v4499_v52 = vld [vmem:[#allocation2 + $0x544] sm:$0xf] }
  0x38   :  { %1581 = vmatpush.bf16.msrb.mxu0 %v3766_v34  ;;  %v3294_v34 = vor.u32 %v4425_v21, %v3293_v20  ;;  %v3245_v48 = vld [vmem:[#allocation2 + $0x278] sm:$0xf]  ;;  %v3054_v51 = vor.u32 %v4365_v45, %v3053_v44  ;;  %v4547_v54 = vld [vmem:[#allocation2 + $0x6c4] sm:$0xf]  ;;  %v3791_v55 = vld [vmem:[#allocation2 + $0x6d8] sm:$0xf0] }
  0x39   :  { %1594 = vmatpush.bf16.msrb.mxu1 %v3002_v35  ;;  %v3650_v35 = vor.u32 %v4511_v24, %v3647_v25  ;;  %v3029_v56 = vld [vmem:[#allocation2 + $0xc8] sm:$0xf]  ;;  %v4359_v57 = vld [vmem:[#allocation2 + $0xdc] sm:$0xf0]  ;;  %v3794_v62 = vor.u32 %v4547_v54, %v3791_v55  ;;  %v3575_v1 = vld [vmem:[#allocation2 + $0x528] sm:$0xf0] }
  0x3a   :  { %1607 = vmatpush.bf16.msrb.mxu2 %v3194_v37  ;;  %v4419_v37 = vld [vmem:[#allocation2 + $0x2bc] sm:$0xf0]  ;;  %v3030_v63 = vor.u32 %v4359_v57, %v3029_v56  ;;  %v4541_v2 = vld [vmem:[#allocation2 + $0x694] sm:$0xf]  ;;  %v3767_v3 = vld [vmem:[#allocation2 + $0x6a8] sm:$0xf0] }
  0x3b   :  { %1620 = vmatpush.bf16.msrb.mxu3 %v3386_v41  ;;  %v3623_v41 = vld [vmem:[#allocation2 + $0x588] sm:$0xf0]  ;;  %v4407_v61 = vld [vmem:[#allocation2 + $0x25c] sm:$0xf0]  ;;  %v4353_v5 = vld [vmem:[#allocation2 + $0xac] sm:$0xf0]  ;;  %v3770_v10 = vor.u32 %v4541_v2, %v3767_v3 }
  0x3c   :  { %1582 = vmatpush.bf16.msrb.mxu0 %v3742_v46  ;;  %v3270_v46 = vor.u32 %v4419_v37, %v3269_v36  ;;  %v3197_v8 = vld [vmem:[#allocation2 + $0x218] sm:$0xf]  ;;  %v4401_v9 = vld [vmem:[#allocation2 + $0x22c] sm:$0xf0]  ;;  %v4535_v16 = vld [vmem:[#allocation2 + $0x664] sm:$0xf] }
  0x3d   :  { %1595 = vmatpush.bf16.msrb.mxu1 %v2978_v47  ;;  %v3626_v47 = vor.u32 %v4505_v40, %v3623_v41  ;;  %v3743_v17 = vld [vmem:[#allocation2 + $0x678] sm:$0xf0]  ;;  %v3198_v20 = vor.u32 %v4401_v9, %v3197_v8  ;;  %v4481_v26 = vld [vmem:[#allocation2 + $0x4b4] sm:$0xf]  ;;  %v3719_v29 = vld [vmem:[#allocation2 + $0x648] sm:$0xf0] }
  0x3e   :  { %1608 = vmatpush.bf16.msrb.mxu2 %v3170_v49  ;;  %v4413_v49 = vld [vmem:[#allocation2 + $0x28c] sm:$0xf0]  ;;  %v3746_v24 = vor.u32 %v4535_v16, %v3743_v17  ;;  %v4529_v28 = vld [vmem:[#allocation2 + $0x634] sm:$0xf]  ;;  %v2957_v32 = vld [vmem:[#allocation2 + $0x38] sm:$0xf] }
  0x3f   :  { %1621 = vmatpush.bf16.msrb.mxu3 %v3362_v53  ;;  %v3599_v53 = vld [vmem:[#allocation2 + $0x558] sm:$0xf0]  ;;  %v3246_v58 = vor.u32 %v4413_v49, %v3245_v48  ;;  %v3149_v36 = vld [vmem:[#allocation2 + $0x1b8] sm:$0xf]  ;;  %v3722_v41 = vor.u32 %v4529_v28, %v3719_v29  ;;  %v4523_v43 = vld [vmem:[#allocation2 + $0x604] sm:$0xf] }
  0x40   :  { %1583 = vmatpush.bf16.msrb.mxu0 %v3718_v59  ;;  %v3602_v59 = vor.u32 %v4499_v52, %v3599_v53  ;;  %v3503_v40 = vld [vmem:[#allocation2 + $0x498] sm:$0xf0]  ;;  %v2933_v45 = vld [vmem:[#allocation2 + $0x8] sm:$0xf]  ;;  %v4473_v48 = vld [vmem:[#allocation2 + $0x46c] sm:$0xf0] }
  0x41   :  { %1596 = vmatpush.bf16.msrb.mxu1 %v2954_v60  ;;  %v3221_v60 = vld [vmem:[#allocation2 + $0x248] sm:$0xf]  ;;  %v3695_v44 = vld [vmem:[#allocation2 + $0x618] sm:$0xf0]  ;;  %v3869_v52 = vld [vmem:[#allocation2 + $0x758] sm:$0xf] }
  0x42   :  { %1609 = vmatpush.bf16.msrb.mxu2 %v3146_v0  ;;  %v4493_v0 = vld [vmem:[#allocation2 + $0x514] sm:$0xf]  ;;  %v3222_v6 = vor.u32 %v4407_v61, %v3221_v60  ;;  %v4569_v54 = vld [vmem:[#allocation2 + $0x76c] sm:$0xf0]  ;;  %v3125_v55 = vld [vmem:[#allocation2 + $0x188] sm:$0xf]  ;;  %v3698_v57 = vor.u32 %v4523_v43, %v3695_v44 }
  0x43   :  { %1622 = vmatpush.bf16.msrb.mxu3 %v3338_v4  ;;  %v3005_v4 = vld [vmem:[#allocation2 + $0x98] sm:$0xf]  ;;  %v3578_v7 = vor.u32 %v4493_v0, %v3575_v1  ;;  %v4383_v56 = vld [vmem:[#allocation2 + $0x19c] sm:$0xf0]  ;;  %v3103_v60 = vld [vmem:[#allocation2 + $0x170] sm:$0xf0]  ;;  %v3870_v0 = vor.u32 %v4569_v54, %v3869_v52 }
  0x44   :  { %1584 = vmatpush.bf16.msrb.mxu0 %v3694_v12  ;;  %v3006_v11 = vor.u32 %v4353_v5, %v3005_v4  ;;  %v4487_v12 = vld [vmem:[#allocation2 + $0x4e4] sm:$0xf]  ;;  %v3126_v1 = vor.u32 %v4383_v56, %v3125_v55  ;;  %v4467_v2 = vld [vmem:[#allocation2 + $0x43c] sm:$0xf0]  ;;  %v3653_v3 = vld [vmem:[#allocation2 + $0x5a8] sm:$0xf] }
  0x45   :  { %1597 = vmatpush.bf16.msrb.mxu1 %v2930_v15  ;;  %v3551_v15 = vld [vmem:[#allocation2 + $0x4f8] sm:$0xf0]  ;;  %v4515_v4 = vld [vmem:[#allocation2 + $0x5bc] sm:$0xf0]  ;;  %v4368_v8 = vld [vmem:[#allocation2 + $0x12c] sm:$0xf] }
  0x46   :  { %1610 = vmatpush.bf16.msrb.mxu2 %v3122_v18  ;;  %v2981_v18 = vld [vmem:[#allocation2 + $0x68] sm:$0xf]  ;;  %v3554_v21 = vor.u32 %v4487_v12, %v3551_v15  ;;  %v3079_v9 = vld [vmem:[#allocation2 + $0x140] sm:$0xf0]  ;;  %v3437_v12 = vld [vmem:[#allocation2 + $0x3f8] sm:$0xf] }
  0x47   :  { %1623 = vmatpush.bf16.msrb.mxu3 %v3314_v27  ;;  %1585 = vmatmul.bf16.vlgmr.msrb.gmra.mxu0 %v4801_v33  ;;  %v3527_v27 = vld [vmem:[#allocation2 + $0x4c8] sm:$0xf0]  ;;  %v4461_v16 = vld [vmem:[#allocation2 + $0x40c] sm:$0xf0]  ;;  %v3629_v17 = vld [vmem:[#allocation2 + $0x578] sm:$0xf] }
  0x48   :  { %1629 = vmatpush.bf16.msra.mxu0 %v3674_v19  ;;  %1598 = vmatmul.bf16.vlgmr.msrb.gmra.mxu1 %v4783_v13  ;;  %v4347_v19 = vld [vmem:[#allocation2 + $0x7c] sm:$0xf0]  ;;  %v3530_v37 = vor.u32 %v4481_v26, %v3527_v27  ;;  %v3413_v26 = vld [vmem:[#allocation2 + $0x3c8] sm:$0xf]  ;;  %v4449_v43 = vld [vmem:[#allocation2 + $0x3ac] sm:$0xf0] }
  0x49   :  { %1642 = vmatpush.bf16.msra.mxu1 %v3866_v22  ;;  %1611 = vmatmul.bf16.vlgmr.msrb.gmra.mxu2 %v4785_v14  ;;  %v3173_v22 = vld [vmem:[#allocation2 + $0x1e8] sm:$0xf]  ;;  %v2982_v25 = vor.u32 %v4347_v19, %v2981_v18  ;;  %v4509_v18 = vld [vmem:[#allocation2 + $0x58c] sm:$0xf0]  ;;  %v3082_v19 = vor.u32 %v4368_v8, %v3079_v9  ;;  %v4455_v28 = vld [vmem:[#allocation2 + $0x3dc] sm:$0xf0] }
  0x4a   :  { %1655 = vmatpush.bf16.msra.mxu2 %v3102_v23  ;;  %1624 = vmatmul.bf16.vlgmr.msrb.gmra.mxu3 %v4792_v30  ;;  %v4395_v23 = vld [vmem:[#allocation2 + $0x1fc] sm:$0xf0]  ;;  %v3605_v29 = vld [vmem:[#allocation2 + $0x548] sm:$0xf]  ;;  %v3581_v44 = vld [vmem:[#allocation2 + $0x518] sm:$0xf] }
  0x4b   :  { %1668 = vmatpush.bf16.msra.mxu3 %v3294_v34  ;;  %v4341_v34 = vld [vmem:[#allocation2 + $0x4c] sm:$0xf0]  ;;  %v4443_v55 = vld [vmem:[#allocation2 + $0x37c] sm:$0xf0]  ;;  %v3557_v56 = vld [vmem:[#allocation2 + $0x4e8] sm:$0xf] }
  0x4c   :  { %1630 = vmatpush.bf16.msra.mxu0 %v3650_v35  ;;  %v3174_v35 = vor.u32 %v4395_v23, %v3173_v22  ;;  %v2958_v42 = vor.u32 %v4341_v34, %v2957_v32  ;;  %v4362_v22 = vld [vmem:[#allocation2 + $0xfc] sm:$0xf]  ;;  %v3055_v23 = vld [vmem:[#allocation2 + $0x110] sm:$0xf0]  ;;  %v4503_v32 = vld [vmem:[#allocation2 + $0x55c] sm:$0xf0] }
  0x4d   :  { %1643 = vmatpush.bf16.msra.mxu1 %v3842_v38  ;;  %v4389_v38 = vld [vmem:[#allocation2 + $0x1cc] sm:$0xf0]  ;;  %v3058_v34 = vor.u32 %v4362_v22, %v3055_v23  ;;  %v4338_v9 = vld [vmem:[#allocation2 + $0x3c] sm:$0xf] }
  0x4e   :  { %1656 = vmatpush.bf16.msra.mxu2 %v3078_v39  ;;  %v4475_v39 = vld [vmem:[#allocation2 + $0x484] sm:$0xf]  ;;  %v3150_v49 = vor.u32 %v4389_v38, %v3149_v36  ;;  %v4551_v36 = vld [vmem:[#allocation2 + $0x6dc] sm:$0xf0]  ;;  %v4533_v8 = vld [vmem:[#allocation2 + $0x64c] sm:$0xf0] }
  0x4f   :  { %1669 = vmatpush.bf16.msra.mxu3 %v3270_v46  ;;  %v4335_v46 = vld [vmem:[#allocation2 + $0x1c] sm:$0xf0]  ;;  %v3506_v53 = vor.u32 %v4475_v39, %v3503_v40  ;;  %v3031_v38 = vld [vmem:[#allocation2 + $0xe0] sm:$0xf0]  ;;  %v3414_v39 = vor.u32 %v4455_v28, %v3413_v26  ;;  %v3606_v40 = vor.u32 %v4503_v32, %v3605_v29  ;;  %v4422_v23 = vld [vmem:[#allocation2 + $0x2dc] sm:$0xf] }
  0x50   :  { %1631 = vmatpush.bf16.msra.mxu0 %v3626_v47  ;;  %v3485_v47 = vld [vmem:[#allocation2 + $0x458] sm:$0xf]  ;;  %v3487_v26 = vld [vmem:[#allocation2 + $0x470] sm:$0xf0] }
  0x51   :  { %1644 = vmatpush.bf16.msra.mxu1 %v3818_v50  ;;  %v3677_v50 = vld [vmem:[#allocation2 + $0x5d8] sm:$0xf]  ;;  %v3486_v61 = vor.u32 %v4473_v48, %v3485_v47  ;;  %v4545_v48 = vld [vmem:[#allocation2 + $0x6ac] sm:$0xf0]  ;;  %v3679_v28 = vld [vmem:[#allocation2 + $0x5f0] sm:$0xf0] }
  0x52   :  { %1657 = vmatpush.bf16.msra.mxu2 %v3054_v51  ;;  %v4521_v51 = vld [vmem:[#allocation2 + $0x5ec] sm:$0xf0]  ;;  %v3773_v47 = vld [vmem:[#allocation2 + $0x698] sm:$0xf] }
  0x53   :  { %1670 = vmatpush.bf16.msra.mxu3 %v3246_v58  ;;  %v2934_v58 = vor.u32 %v4335_v46, %v2933_v45  ;;  %v4497_v45 = vld [vmem:[#allocation2 + $0x52c] sm:$0xf0]  ;;  %v3774_v54 = vor.u32 %v4545_v48, %v3773_v47  ;;  %v4512_v47 = vld [vmem:[#allocation2 + $0x5ac] sm:$0xf]  ;;  %v3655_v48 = vld [vmem:[#allocation2 + $0x5c0] sm:$0xf0] }
  0x54   :  { %1632 = vmatpush.bf16.msra.mxu0 %v3602_v59  ;;  %v4374_v59 = vld [vmem:[#allocation2 + $0x15c] sm:$0xf]  ;;  %v3582_v52 = vor.u32 %v4497_v45, %v3581_v44  ;;  %v4464_v44 = vld [vmem:[#allocation2 + $0x42c] sm:$0xf] }
  0x55   :  { %1645 = vmatpush.bf16.msra.mxu1 %v3794_v62  ;;  %v3678_v62 = vor.u32 %v4521_v51, %v3677_v50  ;;  %v3106_v5 = vor.u32 %v4374_v59, %v3103_v60  ;;  %v3007_v50 = vld [vmem:[#allocation2 + $0xb0] sm:$0xf0]  ;;  %v3749_v59 = vld [vmem:[#allocation2 + $0x668] sm:$0xf]  ;;  %v4539_v60 = vld [vmem:[#allocation2 + $0x67c] sm:$0xf0] }
  0x56   :  { %1658 = vmatpush.bf16.msra.mxu2 %v3030_v63  ;;  %v3461_v63 = vld [vmem:[#allocation2 + $0x428] sm:$0xf] }
  0x57   :  { %1671 = vmatpush.bf16.msra.mxu3 %v3222_v6  ;;  %v3845_v6 = vld [vmem:[#allocation2 + $0x728] sm:$0xf] }
  0x58   :  { %1633 = vmatpush.bf16.msra.mxu0 %v3578_v7  ;;  %v4563_v7 = vld [vmem:[#allocation2 + $0x73c] sm:$0xf0] }
  0x59   :  { %1646 = vmatpush.bf16.msra.mxu1 %v3770_v10  ;;  %v3462_v10 = vor.u32 %v4467_v2, %v3461_v63  ;;  %v3846_v15 = vor.u32 %v4563_v7, %v3845_v6  ;;  %v3750_v2 = vor.u32 %v4539_v60, %v3749_v59  ;;  %v3725_v7 = vld [vmem:[#allocation2 + $0x638] sm:$0xf]  ;;  %v4506_v59 = vld [vmem:[#allocation2 + $0x57c] sm:$0xf]  ;;  %v3631_v60 = vld [vmem:[#allocation2 + $0x590] sm:$0xf0] }
  0x5a   :  { %1659 = vmatpush.bf16.msra.mxu2 %v3006_v11  ;;  %v3654_v11 = vor.u32 %v4515_v4, %v3653_v3  ;;  %v4437_v3 = vld [vmem:[#allocation2 + $0x34c] sm:$0xf0]  ;;  %v3533_v4 = vld [vmem:[#allocation2 + $0x4b8] sm:$0xf] }
  0x5b   :  { %1672 = vmatpush.bf16.msra.mxu3 %v3198_v20  ;;  %v3821_v20 = vld [vmem:[#allocation2 + $0x6f8] sm:$0xf] }
  0x5c   :  { %1634 = vmatpush.bf16.msra.mxu0 %v3554_v21  ;;  %v4557_v21 = vld [vmem:[#allocation2 + $0x70c] sm:$0xf0] }
  0x5d   :  { %1647 = vmatpush.bf16.msra.mxu1 %v3746_v24  ;;  %v3438_v24 = vor.u32 %v4461_v16, %v3437_v12  ;;  %v3822_v27 = vor.u32 %v4557_v21, %v3821_v20  ;;  %v4431_v16 = vld [vmem:[#allocation2 + $0x31c] sm:$0xf0]  ;;  %v3701_v20 = vld [vmem:[#allocation2 + $0x608] sm:$0xf] }
  0x5e   :  { %1660 = vmatpush.bf16.msra.mxu2 %v2982_v25  ;;  %v3630_v25 = vor.u32 %v4509_v18, %v3629_v17  ;;  %v3509_v17 = vld [vmem:[#allocation2 + $0x488] sm:$0xf]  ;;  %v3726_v18 = vor.u32 %v4533_v8, %v3725_v7  ;;  %v4527_v21 = vld [vmem:[#allocation2 + $0x61c] sm:$0xf0]  ;;  %v4500_v7 = vld [vmem:[#allocation2 + $0x54c] sm:$0xf] }
  0x5f   :  { %1673 = vmatpush.bf16.msra.mxu3 %v3174_v35  ;;  %v3797_v35 = vld [vmem:[#allocation2 + $0x6c8] sm:$0xf]  ;;  %v3607_v8 = vld [vmem:[#allocation2 + $0x560] sm:$0xf0] }
  0x60   :  { %1635 = vmatpush.bf16.msra.mxu0 %v3530_v37  ;;  %v4356_v37 = vld [vmem:[#allocation2 + $0xcc] sm:$0xf] }
  0x61   :  { %1648 = vmatpush.bf16.msra.mxu1 %v3722_v41  ;;  %v3389_v41 = vld [vmem:[#allocation2 + $0x398] sm:$0xf]  ;;  %v3034_v46 = vor.u32 %v4356_v37, %v3031_v38  ;;  %v4566_v38 = vld [vmem:[#allocation2 + $0x75c] sm:$0xf] }
  0x62   :  { %1661 = vmatpush.bf16.msra.mxu2 %v2958_v42  ;;  %v3798_v42 = vor.u32 %v4551_v36, %v3797_v35  ;;  %v3390_v51 = vor.u32 %v4449_v43, %v3389_v41  ;;  %v2935_v35 = vld [vmem:[#allocation2 + $0x20] sm:$0xf0]  ;;  %v3702_v36 = vor.u32 %v4527_v21, %v3701_v20  ;;  %v3391_v20 = vld [vmem:[#allocation2 + $0x3b0] sm:$0xf0]  ;;  %v4494_v21 = vld [vmem:[#allocation2 + $0x51c] sm:$0xf] }
  0x63   :  { %1674 = vmatpush.bf16.msra.mxu3 %v3150_v49  ;;  %v4350_v49 = vld [vmem:[#allocation2 + $0x9c] sm:$0xf]  ;;  %v3271_v43 = vld [vmem:[#allocation2 + $0x2c0] sm:$0xf0] }
  0x64   :  { %1636 = vmatpush.bf16.msra.mxu0 %v3506_v53  ;;  %v3365_v53 = vld [vmem:[#allocation2 + $0x368] sm:$0xf] }
  0x65   :  { %1649 = vmatpush.bf16.msra.mxu1 %v3698_v57  ;;  %v4491_v57 = vld [vmem:[#allocation2 + $0x4fc] sm:$0xf0]  ;;  %v3366_v63 = vor.u32 %v4443_v55, %v3365_v53  ;;  %v4410_v55 = vld [vmem:[#allocation2 + $0x27c] sm:$0xf] }
  0x66   :  { %1662 = vmatpush.bf16.msra.mxu2 %v2934_v58  ;;  %v3010_v58 = vor.u32 %v4350_v49, %v3007_v50 }
  0x67   :  { %1675 = vmatpush.bf16.msra.mxu3 %v3126_v1  ;;  %1637 = vmatmul.bf16.vlgmr.msra.gmra.mxu0 %v4794_v31  ;;  %v3341_v1 = vld [vmem:[#allocation2 + $0x338] sm:$0xf] }
  0x68   :  { %1681 = vmatpush.bf16.msrb.mxu0 %v3486_v61  ;;  %1650 = vmatmul.bf16.vlgmr.msra.gmra.mxu1 %v4801_v33  ;;  %v4344_v61 = vld [vmem:[#allocation2 + $0x6c] sm:$0xf] }
  0x69   :  { %1694 = vmatpush.bf16.msrb.mxu1 %v3678_v62  ;;  %1663 = vmatmul.bf16.vlgmr.msra.gmra.mxu2 %v4783_v13  ;;  %v2983_v62 = vld [vmem:[#allocation2 + $0x80] sm:$0xf0] }
  0x6a   :  { %1707 = vmatpush.bf16.msrb.mxu2 %v3870_v0  ;;  %1676 = vmatmul.bf16.vlgmr.msra.gmra.mxu3 %v4785_v14  ;;  %v3558_v0 = vor.u32 %v4491_v57, %v3557_v56  ;;  %v2986_v6 = vor.u32 %v4344_v61, %v2983_v62  ;;  %v3247_v56 = vld [vmem:[#allocation2 + $0x290] sm:$0xf0]  ;;  %v4458_v57 = vld [vmem:[#allocation2 + $0x3fc] sm:$0xf] }
  0x6b   :  { %1720 = vmatpush.bf16.msrb.mxu3 %v3106_v5  ;;  %v4485_v5 = vld [vmem:[#allocation2 + $0x4cc] sm:$0xf0]  ;;  %v3250_v62 = vor.u32 %v4410_v55, %v3247_v56 }
  0x6c   :  { %1682 = vmatpush.bf16.msrb.mxu0 %v3462_v10  ;;  %v2959_v10 = vld [vmem:[#allocation2 + $0x50] sm:$0xf0]  ;;  %v3534_v12 = vor.u32 %v4485_v5, %v3533_v4  ;;  %v3223_v4 = vld [vmem:[#allocation2 + $0x260] sm:$0xf0]  ;;  %v4452_v5 = vld [vmem:[#allocation2 + $0x3cc] sm:$0xf] }
  0x6d   :  { %1695 = vmatpush.bf16.msrb.mxu1 %v3654_v11  ;;  %v3342_v11 = vor.u32 %v4437_v3, %v3341_v1  ;;  %v2962_v22 = vor.u32 %v4338_v9, %v2959_v10  ;;  %v4404_v3 = vld [vmem:[#allocation2 + $0x24c] sm:$0xf] }
  0x6e   :  { %1708 = vmatpush.bf16.msrb.mxu2 %v3846_v15  ;;  %v3317_v15 = vld [vmem:[#allocation2 + $0x308] sm:$0xf]  ;;  %v3226_v10 = vor.u32 %v4404_v3, %v3223_v4  ;;  %v4524_v4 = vld [vmem:[#allocation2 + $0x60c] sm:$0xf] }
  0x6f   :  { %1721 = vmatpush.bf16.msrb.mxu3 %v3082_v19  ;;  %v4479_v19 = vld [vmem:[#allocation2 + $0x49c] sm:$0xf0]  ;;  %v3318_v29 = vor.u32 %v4431_v16, %v3317_v15  ;;  %v3610_v16 = vor.u32 %v4500_v7, %v3607_v8 }
  0x70   :  { %1683 = vmatpush.bf16.msrb.mxu0 %v3438_v24  ;;  %v3295_v24 = vld [vmem:[#allocation2 + $0x2f0] sm:$0xf0]  ;;  %v3510_v32 = vor.u32 %v4479_v19, %v3509_v17  ;;  %v4398_v17 = vld [vmem:[#allocation2 + $0x21c] sm:$0xf]  ;;  %v3493_v8 = vld [vmem:[#allocation2 + $0x460] sm:$0xf] }
  0x71   :  { %1696 = vmatpush.bf16.msrb.mxu1 %v3630_v25  ;;  %v4470_v25 = vld [vmem:[#allocation2 + $0x45c] sm:$0xf]  ;;  %v3298_v37 = vor.u32 %v4422_v23, %v3295_v24 }
  0x72   :  { %1709 = vmatpush.bf16.msrb.mxu2 %v3822_v27  ;;  %v4518_v27 = vld [vmem:[#allocation2 + $0x5dc] sm:$0xf] }
  0x73   :  { %1722 = vmatpush.bf16.msrb.mxu3 %v3058_v34  ;;  %v4332_v34 = vld [vmem:[#allocation2 + $0xc] sm:$0xf]  ;;  %v3682_v41 = vor.u32 %v4518_v27, %v3679_v28  ;;  %v4446_v19 = vld [vmem:[#allocation2 + $0x39c] sm:$0xf] }
  0x74   :  { %1684 = vmatpush.bf16.msrb.mxu0 %v3414_v39  ;;  %v3871_v39 = vld [vmem:[#allocation2 + $0x770] sm:$0xf0]  ;;  %v2938_v45 = vor.u32 %v4332_v34, %v2935_v35  ;;  %v3394_v27 = vor.u32 %v4446_v19, %v3391_v20  ;;  %v4440_v34 = vld [vmem:[#allocation2 + $0x36c] sm:$0xf]  ;;  %v3367_v35 = vld [vmem:[#allocation2 + $0x380] sm:$0xf0] }
  0x75   :  { %1697 = vmatpush.bf16.msrb.mxu1 %v3606_v40  ;;  %v3490_v40 = vor.u32 %v4470_v25, %v3487_v26  ;;  %v3874_v49 = vor.u32 %v4566_v38, %v3871_v39  ;;  %v4542_v25 = vld [vmem:[#allocation2 + $0x69c] sm:$0xf]  ;;  %v3775_v26 = vld [vmem:[#allocation2 + $0x6b0] sm:$0xf0]  ;;  %v3277_v19 = vld [vmem:[#allocation2 + $0x2b0] sm:$0xf] }
  0x76   :  { %1710 = vmatpush.bf16.msrb.mxu2 %v3798_v42  ;;  %v4416_v42 = vld [vmem:[#allocation2 + $0x2ac] sm:$0xf]  ;;  %v3778_v38 = vor.u32 %v4542_v25, %v3775_v26  ;;  %v4420_v20 = vld [vmem:[#allocation2 + $0x2c4] sm:$0xf0]  ;;  %v3661_v26 = vld [vmem:[#allocation2 + $0x5b0] sm:$0xf] }
  0x77   :  { %1723 = vmatpush.bf16.msrb.mxu3 %v3034_v46  ;;  %v3463_v46 = vld [vmem:[#allocation2 + $0x440] sm:$0xf0]  ;;  %v3274_v50 = vor.u32 %v4416_v42, %v3271_v43  ;;  %v3370_v42 = vor.u32 %v4440_v34, %v3367_v35  ;;  %v4468_v25 = vld [vmem:[#allocation2 + $0x444] sm:$0xf0]  ;;  %v3253_v34 = vld [vmem:[#allocation2 + $0x280] sm:$0xf] }
  0x78   :  { %1685 = vmatpush.bf16.msrb.mxu0 %v3390_v51  ;;  %v4560_v51 = vld [vmem:[#allocation2 + $0x72c] sm:$0xf]  ;;  %v3466_v53 = vor.u32 %v4464_v44, %v3463_v46  ;;  %v4386_v44 = vld [vmem:[#allocation2 + $0x1bc] sm:$0xf]  ;;  %v4414_v35 = vld [vmem:[#allocation2 + $0x294] sm:$0xf0] }
  0x79   :  { %1698 = vmatpush.bf16.msrb.mxu1 %v3582_v52  ;;  %v3847_v52 = vld [vmem:[#allocation2 + $0x740] sm:$0xf0]  ;;  %v4434_v46 = vld [vmem:[#allocation2 + $0x33c] sm:$0xf] }
  0x7a   :  { %1711 = vmatpush.bf16.msrb.mxu2 %v3774_v54  ;;  %v3658_v54 = vor.u32 %v4512_v47, %v3655_v48  ;;  %v3850_v61 = vor.u32 %v4560_v51, %v3847_v52  ;;  %v3343_v47 = vld [vmem:[#allocation2 + $0x350] sm:$0xf0]  ;;  %v4482_v48 = vld [vmem:[#allocation2 + $0x4bc] sm:$0xf] }
  0x7b   :  { %1724 = vmatpush.bf16.msrb.mxu3 %v3010_v58  ;;  %v3439_v58 = vld [vmem:[#allocation2 + $0x410] sm:$0xf0]  ;;  %v4530_v52 = vld [vmem:[#allocation2 + $0x63c] sm:$0xf]  ;;  %v3346_v55 = vor.u32 %v4434_v46, %v3343_v47  ;;  %v3229_v46 = vld [vmem:[#allocation2 + $0x250] sm:$0xf] }
  0x7c   :  { %1686 = vmatpush.bf16.msrb.mxu0 %v3366_v63  ;;  %v4554_v63 = vld [vmem:[#allocation2 + $0x6fc] sm:$0xf]  ;;  %v3442_v1 = vor.u32 %v4458_v57, %v3439_v58  ;;  %v3127_v57 = vld [vmem:[#allocation2 + $0x1a0] sm:$0xf0]  ;;  %v4428_v58 = vld [vmem:[#allocation2 + $0x30c] sm:$0xf] }
  0x7d   :  { %1699 = vmatpush.bf16.msrb.mxu1 %v3558_v0  ;;  %v3823_v0 = vld [vmem:[#allocation2 + $0x710] sm:$0xf0]  ;;  %v4408_v47 = vld [vmem:[#allocation2 + $0x264] sm:$0xf0] }
  0x7e   :  { %1712 = vmatpush.bf16.msrb.mxu2 %v3750_v2  ;;  %v3634_v2 = vor.u32 %v4506_v59, %v3631_v60  ;;  %v3826_v9 = vor.u32 %v4554_v63, %v3823_v0  ;;  %v3319_v59 = vld [vmem:[#allocation2 + $0x320] sm:$0xf0]  ;;  %v4476_v60 = vld [vmem:[#allocation2 + $0x48c] sm:$0xf]  ;;  %v4378_v0 = vld [vmem:[#allocation2 + $0x174] sm:$0xf0] }
  0x7f   :  { %1725 = vmatpush.bf16.msrb.mxu3 %v2986_v6  ;;  %v3415_v6 = vld [vmem:[#allocation2 + $0x3e0] sm:$0xf0] }
  0x80   :  { %1687 = vmatpush.bf16.msrb.mxu0 %v3342_v11  ;;  %v4548_v11 = vld [vmem:[#allocation2 + $0x6cc] sm:$0xf]  ;;  %v3418_v15 = vor.u32 %v4452_v5, %v3415_v6  ;;  %v3703_v5 = vld [vmem:[#allocation2 + $0x620] sm:$0xf0]  ;;  %v3322_v6 = vor.u32 %v4428_v58, %v3319_v59  ;;  %v3205_v58 = vld [vmem:[#allocation2 + $0x220] sm:$0xf] }
  0x81   :  { %1700 = vmatpush.bf16.msrb.mxu1 %v3534_v12  ;;  %v3799_v12 = vld [vmem:[#allocation2 + $0x6e0] sm:$0xf0]  ;;  %v4402_v59 = vld [vmem:[#allocation2 + $0x234] sm:$0xf0] }
  0x82   :  { %1713 = vmatpush.bf16.msrb.mxu2 %v3726_v18  ;;  %v3199_v18 = vld [vmem:[#allocation2 + $0x230] sm:$0xf0]  ;;  %v3802_v23 = vor.u32 %v4548_v11, %v3799_v12  ;;  %v4474_v11 = vld [vmem:[#allocation2 + $0x474] sm:$0xf0]  ;;  %v3685_v12 = vld [vmem:[#allocation2 + $0x5e0] sm:$0xf] }
  0x83   :  { %1726 = vmatpush.bf16.msrb.mxu3 %v2962_v22  ;;  %v3583_v22 = vld [vmem:[#allocation2 + $0x530] sm:$0xf0]  ;;  %v3202_v24 = vor.u32 %v4398_v17, %v3199_v18  ;;  %v3085_v17 = vld [vmem:[#allocation2 + $0x130] sm:$0xf]  ;;  %v4372_v18 = vld [vmem:[#allocation2 + $0x144] sm:$0xf0] }
  0x84   :  { %1688 = vmatpush.bf16.msrb.mxu0 %v3318_v29  ;;  %v3586_v28 = vor.u32 %v4494_v21, %v3583_v22  ;;  %v4392_v29 = vld [vmem:[#allocation2 + $0x1ec] sm:$0xf]  ;;  %v3494_v21 = vor.u32 %v4474_v11, %v3493_v8  ;;  %v3181_v8 = vld [vmem:[#allocation2 + $0x1f0] sm:$0xf] }
  0x85   :  { %1701 = vmatpush.bf16.msrb.mxu1 %v3510_v32  ;;  %v3175_v32 = vld [vmem:[#allocation2 + $0x200] sm:$0xf0] }
  0x86   :  { %1714 = vmatpush.bf16.msrb.mxu2 %v3702_v36  ;;  %v4488_v36 = vld [vmem:[#allocation2 + $0x4ec] sm:$0xf]  ;;  %v3178_v39 = vor.u32 %v4392_v29, %v3175_v32  ;;  %v3061_v29 = vld [vmem:[#allocation2 + $0x100] sm:$0xf]  ;;  %v4366_v32 = vld [vmem:[#allocation2 + $0x114] sm:$0xf0] }
  0x87   :  { %1727 = vmatpush.bf16.msrb.mxu3 %v2938_v45  ;;  %1689 = vmatmul.bf16.vlgmr.msrb.gmra.mxu0 %v4792_v30  ;;  %v3151_v45 = vld [vmem:[#allocation2 + $0x1d0] sm:$0xf0] }
  0x88   :  { %1733 = vmatpush.bf16.msra.mxu0 %v3298_v37  ;;  %1702 = vmatmul.bf16.vlgmr.msrb.gmra.mxu1 %v4794_v31  ;;  %v3559_v37 = vld [vmem:[#allocation2 + $0x500] sm:$0xf0]  ;;  %v3154_v51 = vor.u32 %v4386_v44, %v3151_v45  ;;  %v3037_v44 = vld [vmem:[#allocation2 + $0xd0] sm:$0xf]  ;;  %v4360_v45 = vld [vmem:[#allocation2 + $0xe4] sm:$0xf0] }
  0x89   :  { %1746 = vmatpush.bf16.msra.mxu1 %v3490_v40  ;;  %1715 = vmatmul.bf16.vlgmr.msrb.gmra.mxu2 %v4801_v33  ;;  %v4536_v40 = vld [vmem:[#allocation2 + $0x66c] sm:$0xf]  ;;  %v3562_v43 = vor.u32 %v4488_v36, %v3559_v37 }
  0x8a   :  { %1759 = vmatpush.bf16.msra.mxu2 %v3682_v41  ;;  %1728 = vmatmul.bf16.vlgmr.msrb.gmra.mxu3 %v4783_v13  ;;  %v3751_v41 = vld [vmem:[#allocation2 + $0x680] sm:$0xf0] }
  0x8b   :  { %1772 = vmatpush.bf16.msra.mxu3 %v3874_v49  ;;  %v3535_v49 = vld [vmem:[#allocation2 + $0x4d0] sm:$0xf0] }
  0x8c   :  { %1734 = vmatpush.bf16.msra.mxu0 %v3274_v50  ;;  %v3754_v50 = vor.u32 %v4536_v40, %v3751_v41  ;;  %v3538_v56 = vor.u32 %v4482_v48, %v3535_v49  ;;  %v4462_v40 = vld [vmem:[#allocation2 + $0x414] sm:$0xf0]  ;;  %v3637_v41 = vld [vmem:[#allocation2 + $0x580] sm:$0xf] }
  0x8d   :  { %1747 = vmatpush.bf16.msra.mxu1 %v3466_v53  ;;  %v3727_v53 = vld [vmem:[#allocation2 + $0x650] sm:$0xf0] }
  0x8e   :  { %1760 = vmatpush.bf16.msra.mxu2 %v3658_v54  ;;  %v4380_v54 = vld [vmem:[#allocation2 + $0x18c] sm:$0xf]  ;;  %v3730_v63 = vor.u32 %v4530_v52, %v3727_v53  ;;  %v4456_v52 = vld [vmem:[#allocation2 + $0x3e4] sm:$0xf0]  ;;  %v3613_v53 = vld [vmem:[#allocation2 + $0x550] sm:$0xf] }
  0x8f   :  { %1773 = vmatpush.bf16.msra.mxu3 %v3850_v61  ;;  %v3511_v61 = vld [vmem:[#allocation2 + $0x4a0] sm:$0xf0]  ;;  %v3130_v3 = vor.u32 %v4380_v54, %v3127_v57  ;;  %v4504_v54 = vld [vmem:[#allocation2 + $0x564] sm:$0xf0]  ;;  %v4354_v57 = vld [vmem:[#allocation2 + $0xb4] sm:$0xf0] }
  0x90   :  { %1735 = vmatpush.bf16.msra.mxu0 %v3250_v62  ;;  %v3109_v62 = vld [vmem:[#allocation2 + $0x160] sm:$0xf]  ;;  %v3514_v7 = vor.u32 %v4476_v60, %v3511_v61 }
  0x91   :  { %1748 = vmatpush.bf16.msra.mxu1 %v3442_v1  ;;  %v3301_v1 = vld [vmem:[#allocation2 + $0x2e0] sm:$0xf] }
  0x92   :  { %1761 = vmatpush.bf16.msra.mxu2 %v3634_v2  ;;  %v4426_v2 = vld [vmem:[#allocation2 + $0x2f4] sm:$0xf0]  ;;  %v4822_v60 = vld [vmem:[%s5595_s2] sm:$0x3f] }
  0x93   :  { %1774 = vmatpush.bf16.msra.mxu3 %v3826_v9  ;;  %v3110_v9 = vor.u32 %v4378_v0, %v3109_v62  ;;  %v3614_v62 = vor.u32 %v4504_v54, %v3613_v53  ;;  %v4423_v53 = vld [vmem:[#allocation2 + $0x2e4] sm:$0xf]  ;;  %v3517_v54 = vld [vmem:[#allocation2 + $0x490] sm:$0xf] }
  0x94   :  { %1736 = vmatpush.bf16.msra.mxu0 %v3226_v10  ;;  %v3302_v10 = vor.u32 %v4426_v2, %v3301_v1  ;;  %v4450_v1 = vld [vmem:[#allocation2 + $0x3b4] sm:$0xf0]  ;;  %v3589_v2 = vld [vmem:[#allocation2 + $0x520] sm:$0xf] }
  0x95   :  { %1749 = vmatpush.bf16.msra.mxu1 %v3418_v15  ;;  %v4522_v15 = vld [vmem:[#allocation2 + $0x5f4] sm:$0xf0] }
  0x96   :  { %1762 = vmatpush.bf16.msra.mxu2 %v3610_v16  ;;  %v3706_v16 = vor.u32 %v4524_v4, %v3703_v5  ;;  %v3686_v22 = vor.u32 %v4522_v15, %v3685_v12  ;;  %v3206_v4 = vor.u32 %v4402_v59, %v3205_v58  ;;  %v2989_v5 = vld [vmem:[#allocation2 + $0x70] sm:$0xf]  ;;  %v3303_v59 = vld [vmem:[#allocation2 + $0x2f8] sm:$0xf0] }
  0x97   :  { %1775 = vmatpush.bf16.msra.mxu3 %v3802_v23  ;;  %v3469_v23 = vld [vmem:[#allocation2 + $0x430] sm:$0xf] }
  0x98   :  { %1737 = vmatpush.bf16.msra.mxu0 %v3202_v24  ;;  %v3086_v24 = vor.u32 %v4372_v18, %v3085_v17  ;;  %v3470_v36 = vor.u32 %v4468_v25, %v3469_v23  ;;  %v3373_v12 = vld [vmem:[#allocation2 + $0x370] sm:$0xf]  ;;  %v4444_v17 = vld [vmem:[#allocation2 + $0x384] sm:$0xf0]  ;;  %v3157_v25 = vld [vmem:[#allocation2 + $0x1c0] sm:$0xf] }
  0x99   :  { %1750 = vmatpush.bf16.msra.mxu1 %v3394_v27  ;;  %v4516_v27 = vld [vmem:[#allocation2 + $0x5c4] sm:$0xf0]  ;;  %v3565_v18 = vld [vmem:[#allocation2 + $0x4f0] sm:$0xf] }
  0x9a   :  { %1763 = vmatpush.bf16.msra.mxu2 %v3586_v28  ;;  %v3278_v28 = vor.u32 %v4420_v20, %v3277_v19  ;;  %v3662_v37 = vor.u32 %v4516_v27, %v3661_v26  ;;  %v4492_v19 = vld [vmem:[#allocation2 + $0x504] sm:$0xf0]  ;;  %v4390_v26 = vld [vmem:[#allocation2 + $0x1d4] sm:$0xf0]  ;;  %v2941_v27 = vld [vmem:[#allocation2 + $0x10] sm:$0xf] }
  0x9b   :  { %1776 = vmatpush.bf16.msra.mxu3 %v3778_v38  ;;  %v3445_v38 = vld [vmem:[#allocation2 + $0x400] sm:$0xf] }
  0x9c   :  { %1738 = vmatpush.bf16.msra.mxu0 %v3178_v39  ;;  %v3062_v39 = vor.u32 %v4366_v32, %v3061_v29  ;;  %v3446_v48 = vor.u32 %v4462_v40, %v3445_v38  ;;  %v3566_v32 = vor.u32 %v4492_v19, %v3565_v18  ;;  %v4486_v38 = vld [vmem:[#allocation2 + $0x4d4] sm:$0xf0]  ;;  %v4336_v40 = vld [vmem:[#allocation2 + $0x24] sm:$0xf0]  ;;  %v3829_v19 = vld [vmem:[#allocation2 + $0x700] sm:$0xf] }
  0x9d   :  { %1751 = vmatpush.bf16.msra.mxu1 %v3370_v42  ;;  %v4510_v42 = vld [vmem:[#allocation2 + $0x594] sm:$0xf0] }
  0x9e   :  { %1764 = vmatpush.bf16.msra.mxu2 %v3562_v43  ;;  %v3254_v43 = vor.u32 %v4414_v35, %v3253_v34  ;;  %v3638_v49 = vor.u32 %v4510_v42, %v3637_v41  ;;  %v3349_v34 = vld [vmem:[#allocation2 + $0x340] sm:$0xf]  ;;  %v3133_v41 = vld [vmem:[#allocation2 + $0x190] sm:$0xf]  ;;  %v4384_v42 = vld [vmem:[#allocation2 + $0x1a4] sm:$0xf0] }
  0x9f   :  { %1777 = vmatpush.bf16.msra.mxu3 %v3754_v50  ;;  %v3421_v50 = vld [vmem:[#allocation2 + $0x3d0] sm:$0xf] }
  0xa0   :  { %1739 = vmatpush.bf16.msra.mxu0 %v3154_v51  ;;  %v3038_v51 = vor.u32 %v4360_v45, %v3037_v44  ;;  %v3422_v61 = vor.u32 %v4456_v52, %v3421_v50  ;;  %v4570_v44 = vld [vmem:[#allocation2 + $0x774] sm:$0xf0]  ;;  %v4375_v45 = vld [vmem:[#allocation2 + $0x164] sm:$0xf]  ;;  %v4432_v50 = vld [vmem:[#allocation2 + $0x324] sm:$0xf0] }
  0xa1   :  { %1752 = vmatpush.bf16.msra.mxu1 %v3346_v55  ;;  %v3230_v55 = vor.u32 %v4408_v47, %v3229_v46  ;;  %v3111_v46 = vld [vmem:[#allocation2 + $0x178] sm:$0xf0] }
  0xa2   :  { %1765 = vmatpush.bf16.msra.mxu2 %v3538_v56  ;;  %v3013_v56 = vld [vmem:[#allocation2 + $0xa0] sm:$0xf] }
  0xa3   :  { %1778 = vmatpush.bf16.msra.mxu3 %v3730_v63  ;;  %v3397_v63 = vld [vmem:[#allocation2 + $0x3a0] sm:$0xf]  ;;  %v3014_v0 = vor.u32 %v4354_v57, %v3013_v56  ;;  %v3134_v56 = vor.u32 %v4384_v42, %v3133_v41 }
  0xa4   :  { %1740 = vmatpush.bf16.msra.mxu0 %v3130_v3  ;;  %v4498_v3 = vld [vmem:[#allocation2 + $0x534] sm:$0xf0] }
  0xa5   :  { %1753 = vmatpush.bf16.msra.mxu1 %v3322_v6  ;;  %v4348_v6 = vld [vmem:[#allocation2 + $0x84] sm:$0xf0]  ;;  %v3590_v11 = vor.u32 %v4498_v3, %v3589_v2  ;;  %v4369_v3 = vld [vmem:[#allocation2 + $0x134] sm:$0xf] }
  0xa6   :  { %1766 = vmatpush.bf16.msra.mxu2 %v3514_v7  ;;  %v295_v7 = vperm.slane %v4822_v60, 0  ;;  %v2990_v15 = vor.u32 %v4348_v6, %v2989_v5 }
  0xa7   :  { %1779 = vmatpush.bf16.msra.mxu3 %v3706_v16  ;;  %1741 = vmatmul.bf16.vlgmr.msra.gmra.mxu0 %v4785_v14  ;;  %v1534_v16 = vpop.f32.mrf.mxu0 }
  0xa8   :  { %1785 = vmatpush.bf16.msrb.mxu0 %v3110_v9  ;;  %1754 = vmatmul.bf16.vlgmr.msra.gmra.mxu1 %v4792_v30  ;;  %v4396_v9 = vld [vmem:[#allocation2 + $0x204] sm:$0xf0]  ;;  %v1535_v23 = vadd.f32 %v1534_v16, %v295_v7  ;;  %v4465_v16 = vld [vmem:[#allocation2 + $0x434] sm:$0xf] }
  0xa9   :  { %1798 = vmatpush.bf16.msrb.mxu1 %v3302_v10  ;;  %1767 = vmatmul.bf16.vlgmr.msra.gmra.mxu2 %v4794_v31  ;;  %v3398_v10 = vor.u32 %v4450_v1, %v3397_v63  ;;  %v3182_v20 = vor.u32 %v4396_v9, %v3181_v8  ;;  %v3114_v63 = vor.u32 %v4375_v45, %v3111_v46  ;;  %v4564_v1 = vld [vmem:[#allocation2 + $0x744] sm:$0xf0]  ;;  %v3231_v45 = vld [vmem:[#allocation2 + $0x268] sm:$0xf0]  ;;  %v4453_v46 = vld [vmem:[#allocation2 + $0x3d4] sm:$0xf] }
  0xaa   :  { %1811 = vmatpush.bf16.msrb.mxu2 %v3494_v21  ;;  %1780 = vmatmul.bf16.vlgmr.msra.gmra.mxu3 %v4801_v33  ;;  %v2965_v21 = vld [vmem:[#allocation2 + $0x40] sm:$0xf]  ;;  %v3306_v8 = vor.u32 %v4423_v53, %v3303_v59  ;;  %v3015_v53 = vld [vmem:[#allocation2 + $0xb8] sm:$0xf0]  ;;  %v4399_v59 = vld [vmem:[#allocation2 + $0x224] sm:$0xf] }
  0xab   :  { %1824 = vmatpush.bf16.msrb.mxu3 %v3686_v22  ;;  %v4342_v22 = vld [vmem:[#allocation2 + $0x54] sm:$0xf0] }
  0xac   :  { %1786 = vmatpush.bf16.msrb.mxu0 %v3086_v24  ;;  %v1547_v24 = vpop.f32.mrf.mxu1  ;;  %v2966_v35 = vor.u32 %v4342_v22, %v2965_v21  ;;  %v1560_v7 = vpop.f32.mrf.mxu2  ;;  %v4363_v22 = vld [vmem:[#allocation2 + $0x104] sm:$0xf] }
  0xad   :  { %1799 = vmatpush.bf16.msrb.mxu1 %v3278_v28  ;;  %v3374_v28 = vor.u32 %v4444_v17, %v3373_v12  ;;  %v1548_v29 = vadd.f32 %v1547_v24, %v1535_v23  ;;  %v1573_v2 = vpop.f32.mrf.mxu3  ;;  %v3471_v17 = vld [vmem:[#allocation2 + $0x448] sm:$0xf0]  ;;  %v3063_v23 = vld [vmem:[#allocation2 + $0x118] sm:$0xf0] }
  0xae   :  { %1812 = vmatpush.bf16.msrb.mxu2 %v3470_v36  ;;  %v4438_v36 = vld [vmem:[#allocation2 + $0x354] sm:$0xf0] }
  0xaf   :  { %1825 = vmatpush.bf16.msrb.mxu3 %v3662_v37  ;;  %v3541_v37 = vld [vmem:[#allocation2 + $0x4c0] sm:$0xf]  ;;  %v3350_v47 = vor.u32 %v4438_v36, %v3349_v34  ;;  %v1536_v52 = vpop.f32.mrf.mxu0  ;;  %v1561_v9 = vadd.f32 %v1560_v7, %v1548_v29  ;;  %v4459_v29 = vld [vmem:[#allocation2 + $0x404] sm:$0xf]  ;;  %v3066_v34 = vor.u32 %v4363_v22, %v3063_v23  ;;  %v4552_v36 = vld [vmem:[#allocation2 + $0x6e4] sm:$0xf0] }
  0xb0   :  { %1787 = vmatpush.bf16.msrb.mxu0 %v3062_v39  ;;  %v3158_v39 = vor.u32 %v4390_v26, %v3157_v25  ;;  %v3474_v25 = vor.u32 %v4465_v16, %v3471_v17  ;;  %v4411_v26 = vld [vmem:[#allocation2 + $0x284] sm:$0xf]  ;;  %v3733_v17 = vld [vmem:[#allocation2 + $0x640] sm:$0xf]  ;;  %v2967_v22 = vld [vmem:[#allocation2 + $0x58] sm:$0xf0] }
  0xb1   :  { %1800 = vmatpush.bf16.msrb.mxu1 %v3254_v43  ;;  %v3877_v43 = vld [vmem:[#allocation2 + $0x760] sm:$0xf]  ;;  %v1574_v21 = vadd.f32 %v1573_v2, %v1561_v9  ;;  %v4351_v52 = vld [vmem:[#allocation2 + $0xa4] sm:$0xf]  ;;  %v3757_v2 = vld [vmem:[#allocation2 + $0x670] sm:$0xf] }
  0xb2   :  { %1813 = vmatpush.bf16.msrb.mxu2 %v3446_v48  ;;  %v3542_v48 = vor.u32 %v4486_v38, %v3541_v37  ;;  %v3878_v57 = vor.u32 %v4570_v44, %v3877_v43  ;;  %v4357_v38 = vld [vmem:[#allocation2 + $0xd4] sm:$0xf] }
  0xb3   :  { %1826 = vmatpush.bf16.msrb.mxu3 %v3638_v49  ;;  %v3325_v49 = vld [vmem:[#allocation2 + $0x310] sm:$0xf]  ;;  %v4405_v43 = vld [vmem:[#allocation2 + $0x254] sm:$0xf] }
  0xb4   :  { %1788 = vmatpush.bf16.msrb.mxu0 %v3038_v51  ;;  %v2942_v51 = vor.u32 %v4336_v40, %v2941_v27  ;;  %v1549_v58 = vpop.f32.mrf.mxu1  ;;  %v3326_v5 = vor.u32 %v4432_v50, %v3325_v49  ;;  %v1562_v40 = vpop.f32.mrf.mxu2  ;;  %v3781_v49 = vld [vmem:[#allocation2 + $0x6a0] sm:$0xf]  ;;  %v4546_v50 = vld [vmem:[#allocation2 + $0x6b4] sm:$0xf0]  ;;  %v4393_v9 = vld [vmem:[#allocation2 + $0x1f4] sm:$0xf] }
  0xb5   :  { %1801 = vmatpush.bf16.msrb.mxu1 %v3230_v55  ;;  %v4480_v55 = vld [vmem:[#allocation2 + $0x4a4] sm:$0xf0]  ;;  %v1575_v37 = vpop.f32.mrf.mxu3  ;;  %v4333_v40 = vld [vmem:[#allocation2 + $0x14] sm:$0xf] }
  0xb6   :  { %1814 = vmatpush.bf16.msrb.mxu2 %v3422_v61  ;;  %v4471_v61 = vld [vmem:[#allocation2 + $0x464] sm:$0xf]  ;;  %v3518_v6 = vor.u32 %v4480_v55, %v3517_v54  ;;  %v296_v55 = vperm.slane %v4822_v60, 1 }
  0xb7   :  { %1827 = vmatpush.bf16.msrb.mxu3 %v3614_v62  ;;  %v3495_v62 = vld [vmem:[#allocation2 + $0x478] sm:$0xf0] }
  0xb8   :  { %1789 = vmatpush.bf16.msrb.mxu0 %v3014_v0  ;;  %v3853_v0 = vld [vmem:[#allocation2 + $0x730] sm:$0xf] }
  0xb9   :  { %1802 = vmatpush.bf16.msrb.mxu1 %v3206_v4  ;;  %v3087_v4 = vld [vmem:[#allocation2 + $0x148] sm:$0xf0]  ;;  %v3854_v12 = vor.u32 %v4564_v1, %v3853_v0  ;;  %v3399_v0 = vld [vmem:[#allocation2 + $0x3b8] sm:$0xf0]  ;;  %v3018_v1 = vor.u32 %v4351_v52, %v3015_v53  ;;  %v4429_v53 = vld [vmem:[#allocation2 + $0x314] sm:$0xf] }
  0xba   :  { %1815 = vmatpush.bf16.msrb.mxu2 %v3398_v10  ;;  %v3498_v10 = vor.u32 %v4471_v61, %v3495_v62  ;;  %v3090_v18 = vor.u32 %v4369_v3, %v3087_v4  ;;  %v3782_v61 = vor.u32 %v4546_v50, %v3781_v49  ;;  %v3207_v62 = vld [vmem:[#allocation2 + $0x238] sm:$0xf0]  ;;  %v4540_v3 = vld [vmem:[#allocation2 + $0x684] sm:$0xf0]  ;;  %v4345_v4 = vld [vmem:[#allocation2 + $0x74] sm:$0xf] }
  0xbb   :  { %1828 = vmatpush.bf16.msrb.mxu3 %v3590_v11  ;;  %v4417_v11 = vld [vmem:[#allocation2 + $0x2b4] sm:$0xf]  ;;  %v3210_v7 = vor.u32 %v4399_v59, %v3207_v62  ;;  %v3135_v50 = vld [vmem:[#allocation2 + $0x1a8] sm:$0xf0] }
  0xbc   :  { %1790 = vmatpush.bf16.msrb.mxu0 %v2990_v15  ;;  %v3279_v15 = vld [vmem:[#allocation2 + $0x2c8] sm:$0xf0]  ;;  %v4381_v49 = vld [vmem:[#allocation2 + $0x194] sm:$0xf] }
  0xbd   :  { %1803 = vmatpush.bf16.msrb.mxu1 %v3182_v20  ;;  %v4558_v20 = vld [vmem:[#allocation2 + $0x714] sm:$0xf0]  ;;  %v3282_v24 = vor.u32 %v4417_v11, %v3279_v15  ;;  %v3183_v11 = vld [vmem:[#allocation2 + $0x208] sm:$0xf0] }
  0xbe   :  { %1816 = vmatpush.bf16.msrb.mxu2 %v3374_v28  ;;  %v3830_v27 = vor.u32 %v4558_v20, %v3829_v19  ;;  %v3255_v28 = vld [vmem:[#allocation2 + $0x298] sm:$0xf0]  ;;  %v3375_v15 = vld [vmem:[#allocation2 + $0x388] sm:$0xf0] }
  0xbf   :  { %1829 = vmatpush.bf16.msrb.mxu3 %v3566_v32  ;;  %v3447_v32 = vld [vmem:[#allocation2 + $0x418] sm:$0xf0]  ;;  %v3258_v41 = vor.u32 %v4411_v26, %v3255_v28  ;;  %v3663_v59 = vld [vmem:[#allocation2 + $0x5c8] sm:$0xf0] }
  0xc0   :  { %1791 = vmatpush.bf16.msrb.mxu0 %v2966_v35  ;;  %v3805_v35 = vld [vmem:[#allocation2 + $0x6d0] sm:$0xf]  ;;  %v3450_v42 = vor.u32 %v4459_v29, %v3447_v32  ;;  %v3159_v32 = vld [vmem:[#allocation2 + $0x1d8] sm:$0xf0]  ;;  %v3855_v62 = vld [vmem:[#allocation2 + $0x748] sm:$0xf0] }
  0xc1   :  { %1804 = vmatpush.bf16.msrb.mxu1 %v3158_v39  ;;  %v3039_v39 = vld [vmem:[#allocation2 + $0xe8] sm:$0xf0]  ;;  %v3806_v44 = vor.u32 %v4552_v36, %v3805_v35  ;;  %v3351_v35 = vld [vmem:[#allocation2 + $0x358] sm:$0xf0] }
  0xc2   :  { %1817 = vmatpush.bf16.msrb.mxu2 %v3350_v47  ;;  %v3423_v47 = vld [vmem:[#allocation2 + $0x3e8] sm:$0xf0] }
  0xc3   :  { %1830 = vmatpush.bf16.msrb.mxu3 %v3542_v48  ;;  %v3042_v48 = vor.u32 %v4357_v38, %v3039_v39  ;;  %v3426_v58 = vor.u32 %v4453_v46, %v3423_v47  ;;  %v3709_v38 = vld [vmem:[#allocation2 + $0x610] sm:$0xf]  ;;  %v4528_v39 = vld [vmem:[#allocation2 + $0x624] sm:$0xf0] }
  0xc4   :  { %1792 = vmatpush.bf16.msrb.mxu0 %v2942_v51  ;;  %v1586_v51 = vpop.f32.mrf.mxu0 }
  0xc5   :  { %1805 = vmatpush.bf16.msrb.mxu1 %v3134_v56  ;;  %v4829_v54 = vadd.f32 %v1586_v51, %v1574_v21  ;;  %v1599_v56 = vpop.f32.mrf.mxu1  ;;  %v4339_v21 = vld [vmem:[#allocation2 + $0x44] sm:$0xf] }
  0xc6   :  { %1818 = vmatpush.bf16.msrb.mxu2 %v3326_v5  ;;  %v2991_v5 = vld [vmem:[#allocation2 + $0x88] sm:$0xf0]  ;;  %v2970_v37 = vor.u32 %v4339_v21, %v2967_v22  ;;  %v3783_v21 = vld [vmem:[#allocation2 + $0x6b8] sm:$0xf0] }
  0xc7   :  { %1831 = vmatpush.bf16.msrb.mxu3 %v3518_v6  ;;  %1793 = vmatmul.bf16.vlgmr.msrb.gmra.mxu0 %v4783_v13  ;;  %v1600_v6 = vadd.f32 %v1599_v56, %v296_v55  ;;  %v2994_v16 = vor.u32 %v4345_v4, %v2991_v5  ;;  %v3327_v55 = vld [vmem:[#allocation2 + $0x328] sm:$0xf0]  ;;  %v4507_v4 = vld [vmem:[#allocation2 + $0x584] sm:$0xf]  ;;  %v3639_v5 = vld [vmem:[#allocation2 + $0x598] sm:$0xf0] }
  0xc8   :  { %1837 = vmatpush.bf16.msra.mxu0 %v3878_v57  ;;  %1806 = vmatmul.bf16.vlgmr.msrb.gmra.mxu1 %v4785_v14  ;;  %v3234_v57 = vor.u32 %v4405_v43, %v3231_v45  ;;  %v3687_v43 = vld [vmem:[#allocation2 + $0x5f8] sm:$0xf0] }
  0xc9   :  { %1850 = vmatpush.bf16.msra.mxu1 %v3114_v63  ;;  %1819 = vmatmul.bf16.vlgmr.msrb.gmra.mxu2 %v4792_v30  ;;  %v4447_v63 = vld [vmem:[#allocation2 + $0x3a4] sm:$0xf]  ;;  %v3879_v45 = vld [vmem:[#allocation2 + $0x778] sm:$0xf0] }
  0xca   :  { %1863 = vmatpush.bf16.msra.mxu2 %v3306_v8  ;;  %1832 = vmatmul.bf16.vlgmr.msrb.gmra.mxu3 %v4794_v31  ;;  %v3402_v8 = vor.u32 %v4447_v63, %v3399_v0  ;;  %v3138_v63 = vor.u32 %v4381_v49, %v3135_v50  ;;  %v4525_v49 = vld [vmem:[#allocation2 + $0x614] sm:$0xf]  ;;  %v3711_v50 = vld [vmem:[#allocation2 + $0x628] sm:$0xf0] }
  0xcb   :  { %1876 = vmatpush.bf16.msra.mxu3 %v3498_v10  ;;  %v3758_v10 = vor.u32 %v4540_v3, %v3757_v2 }
  0xcc   :  { %1838 = vmatpush.bf16.msra.mxu0 %v3854_v12  ;;  %v4441_v12 = vld [vmem:[#allocation2 + $0x374] sm:$0xf]  ;;  %v1588_v19 = vpop.f32.mrf.mxu0  ;;  %v1612_v20 = vpop.f32.mrf.mxu2 }
  0xcd   :  { %1851 = vmatpush.bf16.msra.mxu1 %v3090_v18  ;;  %v4534_v18 = vld [vmem:[#allocation2 + $0x654] sm:$0xf0]  ;;  %v1601_v23 = vpop.f32.mrf.mxu1  ;;  %v3378_v26 = vor.u32 %v4441_v12, %v3375_v15  ;;  %v1625_v28 = vpop.f32.mrf.mxu3  ;;  %v4549_v12 = vld [vmem:[#allocation2 + $0x6d4] sm:$0xf]  ;;  %v3807_v15 = vld [vmem:[#allocation2 + $0x6e8] sm:$0xf0] }
  0xce   :  { %1864 = vmatpush.bf16.msra.mxu2 %v3282_v24  ;;  %v1613_v24 = vadd.f32 %v1612_v20, %v1600_v6  ;;  %v3734_v29 = vor.u32 %v4534_v18, %v3733_v17  ;;  %v4555_v6 = vld [vmem:[#allocation2 + $0x704] sm:$0xf]  ;;  %v3810_v17 = vor.u32 %v4549_v12, %v3807_v15  ;;  %v3591_v19 = vld [vmem:[#allocation2 + $0x538] sm:$0xf0] }
  0xcf   :  { %1877 = vmatpush.bf16.msra.mxu3 %v3474_v25  ;;  %v3186_v25 = vor.u32 %v4393_v9, %v3183_v11  ;;  %v3615_v11 = vld [vmem:[#allocation2 + $0x568] sm:$0xf0]  ;;  %v4495_v18 = vld [vmem:[#allocation2 + $0x524] sm:$0xf] }
  0xd0   :  { %1839 = vmatpush.bf16.msra.mxu0 %v3830_v27  ;;  %v4387_v27 = vld [vmem:[#allocation2 + $0x1c4] sm:$0xf]  ;;  %v4832_v36 = vadd.f32 %v1625_v28, %v1613_v24  ;;  %v3594_v24 = vor.u32 %v4495_v18, %v3591_v19  ;;  %v3759_v28 = vld [vmem:[#allocation2 + $0x688] sm:$0xf0] }
  0xd1   :  { %1852 = vmatpush.bf16.msra.mxu1 %v3066_v34  ;;  %v4435_v34 = vld [vmem:[#allocation2 + $0x344] sm:$0xf]  ;;  %v3162_v46 = vor.u32 %v4387_v27, %v3159_v32  ;;  %v4537_v27 = vld [vmem:[#allocation2 + $0x674] sm:$0xf] }
  0xd2   :  { %1865 = vmatpush.bf16.msra.mxu2 %v3258_v41  ;;  %v2943_v41 = vld [vmem:[#allocation2 + $0x28] sm:$0xf0]  ;;  %v3354_v47 = vor.u32 %v4435_v34, %v3351_v35  ;;  %v4543_v20 = vld [vmem:[#allocation2 + $0x6a4] sm:$0xf]  ;;  %v3762_v34 = vor.u32 %v4537_v27, %v3759_v28 }
  0xd3   :  { %1878 = vmatpush.bf16.msra.mxu3 %v3450_v42  ;;  %v4519_v42 = vld [vmem:[#allocation2 + $0x5e4] sm:$0xf]  ;;  %v2946_v51 = vor.u32 %v4333_v40, %v2943_v41 }
  0xd4   :  { %1840 = vmatpush.bf16.msra.mxu0 %v3806_v44  ;;  %v4567_v44 = vld [vmem:[#allocation2 + $0x764] sm:$0xf]  ;;  %v3690_v52 = vor.u32 %v4519_v42, %v3687_v43  ;;  %v1614_v56 = vpop.f32.mrf.mxu2 }
  0xd5   :  { %1853 = vmatpush.bf16.msra.mxu1 %v3042_v48  ;;  %v3710_v48 = vor.u32 %v4528_v39, %v3709_v38  ;;  %v1627_v0 = vpop.f32.mrf.mxu3  ;;  %v4483_v35 = vld [vmem:[#allocation2 + $0x4c4] sm:$0xf]  ;;  %v3735_v39 = vld [vmem:[#allocation2 + $0x658] sm:$0xf0] }
  0xd6   :  { %1866 = vmatpush.bf16.msra.mxu2 %v3234_v57  ;;  %v3882_v57 = vor.u32 %v4567_v44, %v3879_v45  ;;  %v4531_v38 = vld [vmem:[#allocation2 + $0x644] sm:$0xf] }
  0xd7   :  { %1879 = vmatpush.bf16.msra.mxu3 %v3426_v58  ;;  %v4513_v58 = vld [vmem:[#allocation2 + $0x5b4] sm:$0xf] }
  0xd8   :  { %1841 = vmatpush.bf16.msra.mxu0 %v3782_v61  ;;  %v4561_v61 = vld [vmem:[#allocation2 + $0x734] sm:$0xf]  ;;  %v3666_v2 = vor.u32 %v4513_v58, %v3663_v59 }
  0xd9   :  { %1854 = vmatpush.bf16.msra.mxu1 %v3018_v1  ;;  %v3330_v1 = vor.u32 %v4429_v53, %v3327_v55  ;;  %v3858_v3 = vor.u32 %v4561_v61, %v3855_v62 }
  0xda   :  { %1867 = vmatpush.bf16.msra.mxu2 %v3210_v7  ;;  %v3831_v7 = vld [vmem:[#allocation2 + $0x718] sm:$0xf0] }
  0xdb   :  { %1880 = vmatpush.bf16.msra.mxu3 %v3402_v8  ;;  %v3642_v8 = vor.u32 %v4507_v4, %v3639_v5  ;;  %v3834_v9 = vor.u32 %v4555_v6, %v3831_v7  ;;  %v298_v4 = vperm.slane %v4822_v60, 3 }
  0xdc   :  { %1842 = vmatpush.bf16.msra.mxu0 %v3758_v10  ;;  %v4501_v10 = vld [vmem:[#allocation2 + $0x554] sm:$0xf] }
  0xdd   :  { %1855 = vmatpush.bf16.msra.mxu1 %v2994_v16  ;;  %v3618_v16 = vor.u32 %v4501_v10, %v3615_v11 }
  0xde   :  { %1868 = vmatpush.bf16.msra.mxu2 %v3186_v25  ;;  %v3786_v25 = vor.u32 %v4543_v20, %v3783_v21 }
  0xdf   :  { %1881 = vmatpush.bf16.msra.mxu3 %v3378_v26  ;;  %v4489_v26 = vld [vmem:[#allocation2 + $0x4f4] sm:$0xf] }
  0xe0   :  { %1843 = vmatpush.bf16.msra.mxu0 %v3734_v29  ;;  %v297_v29 = vperm.slane %v4822_v60, 2 }
  0xe1   :  { %1856 = vmatpush.bf16.msra.mxu1 %v2970_v37  ;;  %v3543_v37 = vld [vmem:[#allocation2 + $0x4d8] sm:$0xf0] }
  0xe2   :  { %1869 = vmatpush.bf16.msra.mxu2 %v3162_v46  ;;  %v3546_v44 = vor.u32 %v4483_v35, %v3543_v37  ;;  %v3738_v46 = vor.u32 %v4531_v38, %v3735_v39  ;;  %v300_v37 = vperm.slane %v4822_v60, 5 }
  0xe3   :  { %1882 = vmatpush.bf16.msra.mxu3 %v3354_v47  ;;  %v4477_v47 = vld [vmem:[#allocation2 + $0x494] sm:$0xf] }
  0xe4   :  { %1844 = vmatpush.bf16.msra.mxu0 %v3710_v48  ;;  %v3519_v48 = vld [vmem:[#allocation2 + $0x4a8] sm:$0xf0] }
  0xe5   :  { %1857 = vmatpush.bf16.msra.mxu1 %v2946_v51  ;;  %v1651_v23 = vpop.f32.mrf.mxu1  ;;  %v3522_v51 = vor.u32 %v4477_v47, %v3519_v48 }
  0xe6   :  { %1870 = vmatpush.bf16.msra.mxu2 %v3138_v63 }
  0xe7   :  { %1845 = vmatmul.bf16.vlgmr.msra.gmra.mxu0 %v4801_v33  ;;  %1883 = vmatpush.bf16.msra.mxu3 %v3330_v1 }
  0xe8   :  { %1889 = vmatpush.bf16.msrb.mxu0 %v3690_v52  ;;  %1858 = vmatmul.bf16.vlgmr.msra.gmra.mxu1 %v4783_v13  ;;  %v1638_v13 = vpop.f32.mrf.mxu0  ;;  %v3714_v52 = vor.u32 %v4525_v49, %v3711_v50 }
  0xe9   :  { %1902 = vmatpush.bf16.msrb.mxu1 %v3882_v57  ;;  %1871 = vmatmul.bf16.vlgmr.msra.gmra.mxu2 %v4785_v14  ;;  %v1639_v22 = vadd.f32 %v1638_v13, %v4832_v36 }
  0xea   :  { %1884 = vmatmul.bf16.vlgmr.msra.gmra.mxu3 %v4792_v30  ;;  %v3567_v30 = vld [vmem:[#allocation2 + $0x508] sm:$0xf0] }
  0xeb   :  { %v4839_v14 = vadd.f32 %v1651_v23, %v1639_v22  ;;  %v3570_v32 = vor.u32 %v4489_v26, %v3567_v30  ;;  %v299_v30 = vperm.slane %v4822_v60, 4 }
  0xec   :  { %1890 = vmatpush.bf16.msrb.mxu0 %v3666_v2  ;;  %v1664_v36 = vpop.f32.mrf.mxu2 }
  0xed   :  { %1903 = vmatpush.bf16.msrb.mxu1 %v3858_v3  ;;  %v1665_v40 = vadd.f32 %v1664_v36, %v297_v29  ;;  %v1653_v42 = vpop.f32.mrf.mxu1  ;;  %v1677_v43 = vpop.f32.mrf.mxu3 }
  0xef   :  { %v1678_v45 = vadd.f32 %v1677_v43, %v1665_v40  ;;  %v1915_v43 = vadd.f32 %v4839_v14, %v4829_v54 }
  0xf0   :  { %1891 = vmatpush.bf16.msrb.mxu0 %v3642_v8  ;;  %v1640_v41 = vpop.f32.mrf.mxu0 }
  0xf1   :  { %1904 = vmatpush.bf16.msrb.mxu1 %v3834_v9 }
  0xf4   :  { %1892 = vmatpush.bf16.msrb.mxu0 %v3618_v16  ;;  %v1666_v53 = vpop.f32.mrf.mxu2 }
  0xf5   :  { %1905 = vmatpush.bf16.msrb.mxu1 %v3810_v17  ;;  %v1679_v55 = vpop.f32.mrf.mxu3 }
  0xf8   :  { %1893 = vmatpush.bf16.msrb.mxu0 %v3594_v24 }
  0xf9   :  { %1906 = vmatpush.bf16.msrb.mxu1 %v3786_v25 }
  0xfc   :  { %1894 = vmatpush.bf16.msrb.mxu0 %v3570_v32 }
  0xfd   :  { %1907 = vmatpush.bf16.msrb.mxu1 %v3762_v34 }
 0x100   :  { %1895 = vmatpush.bf16.msrb.mxu0 %v3546_v44 }
 0x101   :  { %1908 = vmatpush.bf16.msrb.mxu1 %v3738_v46 }
 0x104   :  { %1896 = vmatpush.bf16.msrb.mxu0 %v3522_v51  ;;  %v1690_v56 = vpop.f32.mrf.mxu0 }
 0x105   :  { %1909 = vmatpush.bf16.msrb.mxu1 %v3714_v52  ;;  %v1691_v57 = vadd.f32 %v1690_v56, %v1678_v45  ;;  %v1703_v58 = vpop.f32.mrf.mxu1  ;;  %v4721_v56 = vmov 768.0  }
 0x106   :  { %4688 = vrcp.f32 %v4721_v56  ;;  %v4594_v56 = vld [vmem:[%s5598_s5 + $0xb4] sm:$0xf0] }
 0x107   :  { %1897 = vmatmul.bf16.vlgmr.msrb.gmra.mxu0 %v4794_v31  ;;  %v1704_v59 = vadd.f32 %v1703_v58, %v1691_v57 }
 0x108   :  { %1910 = vmatmul.bf16.vlgmr.msrb.gmra.mxu1 %v4801_v33 }
 0x10c   :  { %v1716_v61 = vpop.f32.mrf.mxu2  ;;  %v1692_v63 = vpop.f32.mrf.mxu0 }
 0x10d   :  { %v4844_v62 = vadd.f32 %v1716_v61, %v1704_v59  ;;  %v1729_v0 = vpop.f32.mrf.mxu3  ;;  %v1705_v1 = vpop.f32.mrf.mxu1  ;;  %v3941_v61 = vld [vmem:[%s5598_s5 + $0x70] sm:$0xf]  ;;  %v4586_v63 = vld [vmem:[%s5598_s5 + $0x74] sm:$0xf0] }
 0x10e   :  { %v1730_v5 = vadd.f32 %v1729_v0, %v298_v4  ;;  %v4861_v57 = vpop.eup %4688  ;;  %v4005_v0 = vld [vmem:[%s5598_s5 + $0xf0] sm:$0xf]  ;;  %v3942_v1 = vor.u32 %v4586_v63, %v3941_v61  ;;  %v4618_v4 = vld [vmem:[%s5598_s5 + $0x174] sm:$0xf0] }
 0x10f   :  { %v1916_v44 = vadd.f32 %v1915_v43, %v4844_v62  ;;  %v1923_v58 = vmul.f32 768.0, %v4861_v57  ;;  %v4612_v43 = vld [vmem:[%s5598_s5 + $0x144] sm:$0xf0]  ;;  %vm1927_vm0 = vweird.f32 %v4861_v57  ;;  %v4626_v61 = vld [vmem:[%s5598_s5 + $0x1b4] sm:$0xf0] }
 0x110   :  { %2595 = vmatpush.bf16.msrb.mxu2 %v3942_v1 }
 0x111   :  { %v1924_v59 = vsub.f32 1.0, %v1923_v58  ;;  %v4037_v58 = vld [vmem:[%s5598_s5 + $0x130] sm:$0xf] }
 0x114   :  { %v1718_v2 = vpop.f32.mrf.mxu2 }
 0x115   :  { %v1731_v3 = vpop.f32.mrf.mxu3  ;;  %v4602_v2 = vld [vmem:[%s5598_s5 + $0xf4] sm:$0xf0] }
 0x116   :  { %v4069_v3 = vld [vmem:[%s5598_s5 + $0x170] sm:$0xf] }
 0x124   :  { %v1742_v6 = vpop.f32.mrf.mxu0 }
 0x125   :  { %v1743_v7 = vadd.f32 %v1742_v6, %v1730_v5  ;;  %v1755_v31 = vpop.f32.mrf.mxu1  ;;  %v4006_v5 = vor.u32 %v4602_v2, %v4005_v0  ;;  %v4070_v6 = vor.u32 %v4618_v4, %v4069_v3  ;;  %v3901_v3 = vld [vmem:[%s5598_s5 + $0x20] sm:$0xf]  ;;  %v4576_v4 = vld [vmem:[%s5598_s5 + $0x24] sm:$0xf0] }
 0x127   :  { %v1756_v8 = vadd.f32 %v1755_v31, %v1743_v7  ;;  %v4133_v7 = vld [vmem:[%s5598_s5 + $0x1f0] sm:$0xf]  ;;  %v4634_v31 = vld [vmem:[%s5598_s5 + $0x1f4] sm:$0xf0]  ;;  %2608 = vmatpush.bf16.msrb.mxu3 %v4006_v5  ;;  %2621 = vmatpush.bf16.msra.mxu0 %v4070_v6 }
 0x12c   :  { %v1768_v33 = vpop.f32.mrf.mxu2  ;;  %v1744_v10 = vpop.f32.mrf.mxu0 }
 0x12d   :  { %v1769_v9 = vadd.f32 %v1768_v33, %v1756_v8  ;;  %v1781_v11 = vpop.f32.mrf.mxu3  ;;  %v1757_v12 = vpop.f32.mrf.mxu1  ;;  %v3933_v8 = vld [vmem:[%s5598_s5 + $0x60] sm:$0xf]  ;;  %v4134_v33 = vor.u32 %v4634_v31, %v4133_v7  ;;  %v4592_v31 = vld [vmem:[%s5598_s5 + $0xa4] sm:$0xf0] }
 0x12e   :  { %v3997_v10 = vld [vmem:[%s5598_s5 + $0xe0] sm:$0xf] }
 0x12f   :  { %v4847_v15 = vadd.f32 %v1781_v11, %v1769_v9  ;;  %v4584_v9 = vld [vmem:[%s5598_s5 + $0x64] sm:$0xf0]  ;;  %2634 = vmatpush.bf16.msra.mxu1 %v4134_v33  ;;  %v3965_v7 = vld [vmem:[%s5598_s5 + $0xa0] sm:$0xf] }
 0x130   :  { %v4600_v11 = vld [vmem:[%s5598_s5 + $0xe4] sm:$0xf0]  ;;  %v3934_v12 = vor.u32 %v4584_v9, %v3933_v8  ;;  %v4029_v8 = vld [vmem:[%s5598_s5 + $0x120] sm:$0xf] }
 0x131   :  { %v1917_v48 = vadd.f32 %v1916_v44, %v4847_v15  ;;  %v4109_v44 = vld [vmem:[%s5598_s5 + $0x1c0] sm:$0xf] }
 0x132   :  { %2596 = vmatpush.bf16.msrb.mxu2 %v3934_v12  ;;  %v4093_v12 = vld [vmem:[%s5598_s5 + $0x1a0] sm:$0xf] }
 0x134   :  { %v1770_v16 = vpop.f32.mrf.mxu2 }
 0x135   :  { %v1783_v17 = vpop.f32.mrf.mxu3  ;;  %v3998_v16 = vor.u32 %v4600_v11, %v3997_v10  ;;  %v4608_v11 = vld [vmem:[%s5598_s5 + $0x124] sm:$0xf0] }
 0x136   :  { %v4061_v17 = vld [vmem:[%s5598_s5 + $0x160] sm:$0xf] }
 0x137   :  { %2609 = vmatpush.bf16.msrb.mxu3 %v3998_v16  ;;  %v4624_v16 = vld [vmem:[%s5598_s5 + $0x1a4] sm:$0xf0] }
 0x144   :  { %v1794_v19 = vpop.f32.mrf.mxu0 }
 0x145   :  { %v1807_v18 = vpop.f32.mrf.mxu1  ;;  %v1795_v34 = vadd.f32 %v1794_v19, %v299_v30  ;;  %v4125_v19 = vld [vmem:[%s5598_s5 + $0x1e0] sm:$0xf]  ;;  %v4053_v30 = vld [vmem:[%s5598_s5 + $0x150] sm:$0xf] }
 0x147   :  { %v1808_v35 = vadd.f32 %v1807_v18, %v1795_v34  ;;  %v4616_v18 = vld [vmem:[%s5598_s5 + $0x164] sm:$0xf0] }
 0x14c   :  { %v1820_v13 = vpop.f32.mrf.mxu2  ;;  %v1796_v21 = vpop.f32.mrf.mxu0 }
 0x14d   :  { %v1833_v20 = vpop.f32.mrf.mxu3  ;;  %v1809_v22 = vpop.f32.mrf.mxu1  ;;  %v1821_v39 = vadd.f32 %v1820_v13, %v1808_v35  ;;  %v1925_v13 = vmul.f32 %v4861_v57, %v1924_v59  ;;  %v4632_v21 = vld [vmem:[%s5598_s5 + $0x1e4] sm:$0xf0]  ;;  %v4610_v59 = vld [vmem:[%s5598_s5 + $0x134] sm:$0xf0] }
 0x14e   :  { %v3925_v22 = vld [vmem:[%s5598_s5 + $0x50] sm:$0xf]  ;;  %v4038_v5 = vor.u32 %v4610_v59, %v4037_v58  ;;  %v4650_v59 = vld [vmem:[%s5598_s5 + $0x274] sm:$0xf0] }
 0x14f   :  { %v1834_v41 = vadd.f32 %v1833_v20, %v1821_v39  ;;  %v4062_v20 = vor.u32 %v4616_v18, %v4061_v17  ;;  %v1926_v39 = vadd.f32 %v4861_v57, %v1925_v13  ;;  %v3966_v18 = vor.u32 %v4592_v31, %v3965_v7  ;;  %v4574_v13 = vld [vmem:[%s5598_s5 + $0x14] sm:$0xf0]  ;;  %v4648_v7 = vld [vmem:[%s5598_s5 + $0x264] sm:$0xf0] }
 0x151   :  { %2622 = vmatpush.bf16.msra.mxu0 %v4062_v20  ;;  %v4094_v20 = vor.u32 %v4624_v16, %v4093_v12  ;;  %v4664_v12 = vld [vmem:[%s5598_s5 + $0x2e4] sm:$0xf0]  ;;  %v4583_v16 = vld [vmem:[%s5598_s5 + $0x64] sm:$0xf] }
 0x154   :  { %v1822_v23 = vpop.f32.mrf.mxu2 }
 0x155   :  { %v1835_v24 = vpop.f32.mrf.mxu3  ;;  %v4582_v23 = vld [vmem:[%s5598_s5 + $0x54] sm:$0xf0] }
 0x156   :  { %v4126_v24 = vor.u32 %v4632_v21, %v4125_v19  ;;  %v3893_v19 = vld [vmem:[%s5598_s5 + $0x10] sm:$0xf] }
 0x157   :  { %v3957_v21 = vld [vmem:[%s5598_s5 + $0x90] sm:$0xf] }
 0x158   :  { %2635 = vmatpush.bf16.msra.mxu1 %v4126_v24 }
 0x164   :  { %v1846_v25 = vpop.f32.mrf.mxu0 }
 0x165   :  { %v1859_v26 = vpop.f32.mrf.mxu1  ;;  %v4854_v45 = vadd.f32 %v1846_v25, %v1834_v41  ;;  %v3989_v25 = vld [vmem:[%s5598_s5 + $0xd0] sm:$0xf]  ;;  %v4596_v41 = vld [vmem:[%s5598_s5 + $0xc4] sm:$0xf0] }
 0x166   :  { %v1860_v40 = vadd.f32 %v1859_v26, %v300_v37  ;;  %v4598_v26 = vld [vmem:[%s5598_s5 + $0xd4] sm:$0xf0]  ;;  %v3917_v37 = vld [vmem:[%s5598_s5 + $0x40] sm:$0xf] }
 0x167   :  { %v1918_v51 = vadd.f32 %v1917_v48, %v4854_v45  ;;  %v3990_v34 = vor.u32 %v4598_v26, %v3989_v25 }
 0x169   :  { %2610 = vmatpush.bf16.msrb.mxu3 %v3990_v34 }
 0x16c   :  { %v1848_v27 = vpop.f32.mrf.mxu0  ;;  %v1872_v29 = vpop.f32.mrf.mxu2 }
 0x16d   :  { %v1861_v28 = vpop.f32.mrf.mxu1  ;;  %v1885_v32 = vpop.f32.mrf.mxu3  ;;  %v1873_v42 = vadd.f32 %v1872_v29, %v1860_v40  ;;  %v3926_v27 = vor.u32 %v4582_v23, %v3925_v22  ;;  %v4117_v29 = vld [vmem:[%s5598_s5 + $0x1d0] sm:$0xf]  ;;  %v4590_v22 = vld [vmem:[%s5598_s5 + $0x94] sm:$0xf0] }
 0x16e   :  { %v4614_v28 = vld [vmem:[%s5598_s5 + $0x154] sm:$0xf0]  ;;  %v4021_v23 = vld [vmem:[%s5598_s5 + $0x110] sm:$0xf] }
 0x16f   :  { %v1886_v46 = vadd.f32 %v1885_v32, %v1873_v42  ;;  %v4630_v32 = vld [vmem:[%s5598_s5 + $0x1d4] sm:$0xf0]  ;;  %v4054_v35 = vor.u32 %v4614_v28, %v4053_v30  ;;  %v4045_v42 = vld [vmem:[%s5598_s5 + $0x140] sm:$0xf]  ;;  %2597 = vmatpush.bf16.msrb.mxu2 %v3926_v27  ;;  %v4085_v27 = vld [vmem:[%s5598_s5 + $0x190] sm:$0xf] }
 0x170   :  { %v4118_v40 = vor.u32 %v4630_v32, %v4117_v29  ;;  %v4606_v30 = vld [vmem:[%s5598_s5 + $0x114] sm:$0xf0]  ;;  %v3894_v29 = vor.u32 %v4574_v13, %v3893_v19 }
 0x171   :  { %2623 = vmatpush.bf16.msra.mxu0 %v4054_v35  ;;  %v4622_v28 = vld [vmem:[%s5598_s5 + $0x194] sm:$0xf0]  ;;  %v3958_v35 = vor.u32 %v4590_v22, %v3957_v21  ;;  %v4245_v21 = vld [vmem:[%s5598_s5 + $0x2d0] sm:$0xf] }
 0x172   :  { %2636 = vmatpush.bf16.msra.mxu1 %v4118_v40 }
 0x174   :  { %v1874_v36 = vpop.f32.mrf.mxu2 }
 0x175   :  { %v1887_v38 = vpop.f32.mrf.mxu3  ;;  %v4580_v36 = vld [vmem:[%s5598_s5 + $0x44] sm:$0xf0] }
 0x176   :  { %v3981_v38 = vld [vmem:[%s5598_s5 + $0xc0] sm:$0xf] }
 0x177   :  { %v3982_v48 = vor.u32 %v4596_v41, %v3981_v38 }
 0x179   :  { %2611 = vmatpush.bf16.msrb.mxu3 %v3982_v48  ;;  %v4013_v48 = vld [vmem:[%s5598_s5 + $0x100] sm:$0xf] }
 0x184   :  { %v1898_v47 = vpop.f32.mrf.mxu0 }
 0x185   :  { %v1899_v49 = vadd.f32 %v1898_v47, %v1886_v46  ;;  %v1911_v50 = vpop.f32.mrf.mxu1  ;;  %v4628_v46 = vld [vmem:[%s5598_s5 + $0x1c4] sm:$0xf0]  ;;  %v3918_v47 = vor.u32 %v4580_v36, %v3917_v37  ;;  %v4022_v37 = vor.u32 %v4606_v30, %v4021_v23  ;;  %v4086_v36 = vor.u32 %v4622_v28, %v4085_v27  ;;  %v4662_v23 = vld [vmem:[%s5598_s5 + $0x2d4] sm:$0xf0]  ;;  %v4597_v28 = vld [vmem:[%s5598_s5 + $0xd4] sm:$0xf] }
 0x186   :  { %v4246_v30 = vor.u32 %v4662_v23, %v4245_v21  ;;  %v4636_v23 = vld [vmem:[%s5598_s5 + $0x204] sm:$0xf0] }
 0x187   :  { %v4857_v60 = vadd.f32 %v1911_v50, %v1899_v49  ;;  %v4046_v49 = vor.u32 %v4612_v43, %v4045_v42  ;;  %v3909_v50 = vld [vmem:[%s5598_s5 + $0x30] sm:$0xf]  ;;  %2598 = vmatpush.bf16.msrb.mxu2 %v3918_v47  ;;  %v3885_v42 = vld [vmem:[%s5598_s5] sm:$0xf]  ;;  %v4572_v43 = vld [vmem:[%s5598_s5 + $0x4] sm:$0xf0] }
 0x188   :  { %v4588_v47 = vld [vmem:[%s5598_s5 + $0x84] sm:$0xf0] }
 0x189   :  { %v1919_v52 = vadd.f32 %v1918_v51, %v4857_v60  ;;  %v4578_v51 = vld [vmem:[%s5598_s5 + $0x34] sm:$0xf0]  ;;  %2624 = vmatpush.bf16.msra.mxu0 %v4046_v49  ;;  %v4604_v49 = vld [vmem:[%s5598_s5 + $0x104] sm:$0xf0] }
 0x18a   :  { %v3910_v0 = vor.u32 %v4578_v51, %v3909_v50  ;;  %v4014_v51 = vor.u32 %v4604_v49, %v4013_v48  ;;  %v4229_v48 = vld [vmem:[%s5598_s5 + $0x2b0] sm:$0xf] }
 0x18b   :  { %1920 = vadd.xlane.f32.xlu0 %v1919_v52  ;;  %v4970_v52 = vsel %vm1927_vm0, %v4861_v57, %v1926_v39  ;;  %v4101_v57 = vld [vmem:[%s5598_s5 + $0x1b0] sm:$0xf] }
 0x18c   :  { %v1900_v53 = vpop.f32.mrf.mxu0  ;;  %v4102_v6 = vor.u32 %v4626_v61, %v4101_v57  ;;  %2599 = vmatpush.bf16.msrb.mxu2 %v3910_v0  ;;  %v4261_v57 = vld [vmem:[%s5598_s5 + $0x2f0] sm:$0xf]  ;;  %v4666_v61 = vld [vmem:[%s5598_s5 + $0x2f4] sm:$0xf0] }
 0x18d   :  { %v1913_v55 = vpop.f32.mrf.mxu1  ;;  %v4110_v53 = vor.u32 %v4628_v46, %v4109_v44  ;;  %2625 = vmatpush.bf16.msra.mxu0 %v4038_v5  ;;  %v3949_v44 = vld [vmem:[%s5598_s5 + $0x80] sm:$0xf]  ;;  %v3886_v46 = vor.u32 %v4572_v43, %v3885_v42  ;;  %v4262_v0 = vor.u32 %v4666_v61, %v4261_v57  ;;  %v4007_v5 = vld [vmem:[%s5598_s5 + $0xf8] sm:$0xf0]  ;;  %v4595_v42 = vld [vmem:[%s5598_s5 + $0xc4] sm:$0xf] }
 0x18e   :  { %v3973_v55 = vld [vmem:[%s5598_s5 + $0xb0] sm:$0xf]  ;;  %v3950_v50 = vor.u32 %v4588_v47, %v3949_v44  ;;  %v3983_v43 = vld [vmem:[%s5598_s5 + $0xc8] sm:$0xf0]  ;;  %v4642_v47 = vld [vmem:[%s5598_s5 + $0x234] sm:$0xf0] }
 0x18f   :  { %v3974_v2 = vor.u32 %v4594_v56, %v3973_v55  ;;  %2637 = vmatpush.bf16.msra.mxu1 %v4110_v53  ;;  %v4077_v53 = vld [vmem:[%s5598_s5 + $0x180] sm:$0xf]  ;;  %v4620_v55 = vld [vmem:[%s5598_s5 + $0x184] sm:$0xf0]  ;;  %v4197_v56 = vld [vmem:[%s5598_s5 + $0x270] sm:$0xf]  ;;  %v3986_v44 = vor.u32 %v4595_v42, %v3983_v43 }
 0x190   :  { %v4078_v58 = vor.u32 %v4620_v55, %v4077_v53  ;;  %v3911_v53 = vld [vmem:[%s5598_s5 + $0x38] sm:$0xf0]  ;;  %v4157_v61 = vld [vmem:[%s5598_s5 + $0x220] sm:$0xf] }
 0x191   :  { %2612 = vmatpush.bf16.msrb.mxu3 %v3974_v2  ;;  %v3943_v2 = vld [vmem:[%s5598_s5 + $0x78] sm:$0xf0]  ;;  %v5289_v43 = vld [vmem:[%s5596_s3] sm:$0x3f] }
 0x193   :  { %2638 = vmatpush.bf16.msra.mxu1 %v4102_v6  ;;  %v4189_v6 = vld [vmem:[%s5598_s5 + $0x260] sm:$0xf] }
 0x195   :  { %2613 = vmatpush.bf16.msrb.mxu3 %v3966_v18  ;;  %v3999_v18 = vld [vmem:[%s5598_s5 + $0xe8] sm:$0xf0] }
 0x197   :  { %2639 = vmatpush.bf16.msra.mxu1 %v4094_v20  ;;  %v4646_v20 = vld [vmem:[%s5598_s5 + $0x254] sm:$0xf0] }
 0x199   :  { %2614 = vmatpush.bf16.msrb.mxu3 %v3958_v35  ;;  %v4644_v35 = vld [vmem:[%s5598_s5 + $0x244] sm:$0xf0] }
 0x19b   :  { %2640 = vmatpush.bf16.msra.mxu1 %v4086_v36 }
 0x19d   :  { %2615 = vmatpush.bf16.msrb.mxu3 %v3950_v50  ;;  %v4658_v50 = vld [vmem:[%s5598_s5 + $0x2b4] sm:$0xf0] }
 0x19e   :  { %v4230_v55 = vor.u32 %v4658_v50, %v4229_v48  ;;  %v1971_v50 = vperm.slane %v5289_v43, 2 }
 0x19f   :  { %2641 = vmatpush.bf16.msra.mxu1 %v4078_v58  ;;  %v4593_v58 = vld [vmem:[%s5598_s5 + $0xb4] sm:$0xf] }
 0x1a1   :  { %2660 = vmatpush.bf16.msra.mxu3 %v4262_v0  ;;  %v4221_v0 = vld [vmem:[%s5598_s5 + $0x2a0] sm:$0xf] }
 0x1fe   :  { %v1921_v63 = vpop.xlane.xlu0 %1920 }
 0x1ff   :  { %v1929_v1 = vmul.f32 %v4970_v52, %v1921_v63  ;;  %v4198_v63 = vor.u32 %v4650_v59, %v4197_v56  ;;  %v3975_v59 = vld [vmem:[%s5598_s5 + $0xb8] sm:$0xf0] }
 0x200   :  { %v3978_v57 = vor.u32 %v4593_v58, %v3975_v59 }
 0x201   :  { %v5007_v33 = vsub.f32 %v4829_v54, %v1929_v1  ;;  %v5010_v9 = vsub.f32 %v4839_v14, %v1929_v1  ;;  %v5013_v10 = vsub.f32 %v4844_v62, %v1929_v1  ;;  %v3902_v54 = vor.u32 %v4576_v4, %v3901_v3  ;;  %v4601_v3 = vld [vmem:[%s5598_s5 + $0xf4] sm:$0xf] }
 0x202   :  { %v5025_v14 = vsub.f32 %v4847_v15, %v1929_v1  ;;  %v4030_v15 = vor.u32 %v4608_v11, %v4029_v8  ;;  %v5047_v24 = vsub.f32 %v4854_v45, %v1929_v1  ;;  %v5061_v45 = vsub.f32 %v4857_v60, %v1929_v1  ;;  %v4585_v1 = vld [vmem:[%s5598_s5 + $0x74] sm:$0xf]  ;;  %v4253_v11 = vld [vmem:[%s5598_s5 + $0x2e0] sm:$0xf] }
 0x203   :  { %v1936_v62 = vmul.f32 %v5007_v33, %v5007_v33  ;;  %v1937_v17 = vmul.f32 %v5010_v9, %v5010_v9  ;;  %v1938_v25 = vmul.f32 %v5013_v10, %v5013_v10  ;;  %2600 = vmatpush.bf16.msrb.mxu2 %v3902_v54  ;;  %v3946_v4 = vor.u32 %v4585_v1, %v3943_v2  ;;  %v4656_v2 = vld [vmem:[%s5598_s5 + $0x2a4] sm:$0xf0] }
 0x204   :  { %v1939_v32 = vmul.f32 %v5025_v14, %v5025_v14  ;;  %2626 = vmatpush.bf16.msra.mxu0 %v4030_v15  ;;  %v1940_v38 = vmul.f32 %v5047_v24, %v5047_v24  ;;  %v1941_v40 = vmul.f32 %v5061_v45, %v5061_v45  ;;  %v4010_v31 = vor.u32 %v4601_v3, %v4007_v5  ;;  %v4181_v15 = vld [vmem:[%s5598_s5 + $0x250] sm:$0xf]  ;;  %v4575_v3 = vld [vmem:[%s5598_s5 + $0x24] sm:$0xf] }
 0x205   :  { %v1942_v26 = vadd.f32 %v1937_v17, %v1936_v62  ;;  %v4190_v8 = vor.u32 %v4648_v7, %v4189_v6  ;;  %v4254_v54 = vor.u32 %v4664_v12, %v4253_v11  ;;  %v3935_v62 = vld [vmem:[%s5598_s5 + $0x68] sm:$0xf0]  ;;  %v4599_v17 = vld [vmem:[%s5598_s5 + $0xe4] sm:$0xf]  ;;  %v4182_v22 = vor.u32 %v4646_v20, %v4181_v15  ;;  %v4638_v12 = vld [vmem:[%s5598_s5 + $0x214] sm:$0xf0] }
 0x206   :  { %2686 = vmatpush.bf16.msrb.mxu1 %v4010_v31  ;;  %v3938_v19 = vor.u32 %v4583_v16, %v3935_v62  ;;  %v4002_v13 = vor.u32 %v4599_v17, %v3999_v18  ;;  %v4222_v5 = vor.u32 %v4656_v2, %v4221_v0  ;;  %v4591_v7 = vld [vmem:[%s5598_s5 + $0xa4] sm:$0xf]  ;;  %v3967_v31 = vld [vmem:[%s5598_s5 + $0xa8] sm:$0xf0]  ;;  %v4213_v16 = vld [vmem:[%s5598_s5 + $0x290] sm:$0xf] }
 0x207   :  { %v1943_v34 = vadd.f32 %v1942_v26, %v1938_v25  ;;  %2601 = vmatpush.bf16.msrb.mxu2 %v3894_v29  ;;  %2661 = vmatpush.bf16.msra.mxu3 %v4254_v54  ;;  %v4581_v25 = vld [vmem:[%s5598_s5 + $0x54] sm:$0xf]  ;;  %v3927_v26 = vld [vmem:[%s5598_s5 + $0x58] sm:$0xf0]  ;;  %v3970_v11 = vor.u32 %v4591_v7, %v3967_v31  ;;  %v4654_v54 = vld [vmem:[%s5598_s5 + $0x294] sm:$0xf0] }
 0x208   :  { %2627 = vmatpush.bf16.msra.mxu0 %v4022_v37  ;;  %v3930_v27 = vor.u32 %v4581_v25, %v3927_v26  ;;  %v3991_v29 = vld [vmem:[%s5598_s5 + $0xd8] sm:$0xf0]  ;;  %v4237_v37 = vld [vmem:[%s5598_s5 + $0x2c0] sm:$0xf]  ;;  %v4573_v62 = vld [vmem:[%s5598_s5 + $0x14] sm:$0xf] }
 0x209   :  { %v1944_v39 = vadd.f32 %v1943_v34, %v1939_v32  ;;  %v3994_v32 = vor.u32 %v4597_v28, %v3991_v29  ;;  %v4173_v34 = vld [vmem:[%s5598_s5 + $0x240] sm:$0xf]  ;;  %v3895_v17 = vld [vmem:[%s5598_s5 + $0x18] sm:$0xf0]  ;;  %v4589_v18 = vld [vmem:[%s5598_s5 + $0x94] sm:$0xf] }
 0x20a   :  { %2687 = vmatpush.bf16.msrb.mxu1 %v4002_v13  ;;  %v4174_v36 = vor.u32 %v4644_v35, %v4173_v34  ;;  %v4214_v13 = vor.u32 %v4654_v54, %v4213_v16  ;;  %v3959_v15 = vld [vmem:[%s5598_s5 + $0x98] sm:$0xf0]  ;;  %v3898_v20 = vor.u32 %v4573_v62, %v3895_v17  ;;  %v4205_v26 = vld [vmem:[%s5598_s5 + $0x280] sm:$0xf]  ;;  %v3887_v29 = vld [vmem:[%s5598_s5 + $0x8] sm:$0xf0] }
 0x20b   :  { %v1945_v60 = vadd.f32 %v1944_v39, %v1940_v38  ;;  %2602 = vmatpush.bf16.msrb.mxu2 %v3886_v46  ;;  %2662 = vmatpush.bf16.msra.mxu3 %v4246_v30  ;;  %v4660_v38 = vld [vmem:[%s5598_s5 + $0x2c4] sm:$0xf0]  ;;  %v4579_v39 = vld [vmem:[%s5598_s5 + $0x44] sm:$0xf]  ;;  %v4165_v46 = vld [vmem:[%s5598_s5 + $0x230] sm:$0xf]  ;;  %v3962_v21 = vor.u32 %v4589_v18, %v3959_v15 }
 0x20c   :  { %2628 = vmatpush.bf16.msra.mxu0 %v4014_v51  ;;  %v4166_v49 = vor.u32 %v4642_v47, %v4165_v46  ;;  %v4577_v51 = vld [vmem:[%s5598_s5 + $0x34] sm:$0xf]  ;;  %v4652_v30 = vld [vmem:[%s5598_s5 + $0x284] sm:$0xf0]  ;;  %v3951_v34 = vld [vmem:[%s5598_s5 + $0x88] sm:$0xf0] }
 0x20d   :  { %v1946_v41 = vadd.f32 %v1945_v60, %v1941_v40  ;;  %v3919_v40 = vld [vmem:[%s5598_s5 + $0x48] sm:$0xf0]  ;;  %v4238_v60 = vor.u32 %v4660_v38, %v4237_v37  ;;  %v3914_v56 = vor.u32 %v4577_v51, %v3911_v53  ;;  %v4206_v28 = vor.u32 %v4652_v30, %v4205_v26  ;;  %v4617_v0 = vld [vmem:[%s5598_s5 + $0x174] sm:$0xf]  ;;  %v4663_v30 = vld [vmem:[%s5598_s5 + $0x2e4] sm:$0xf] }
 0x20e   :  { %2688 = vmatpush.bf16.msrb.mxu1 %v3994_v32  ;;  %v4587_v32 = vld [vmem:[%s5598_s5 + $0x84] sm:$0xf]  ;;  %v1969_v47 = vperm.slane %v5289_v43, 0  ;;  %v1972_v51 = vperm.slane %v5289_v43, 3  ;;  %v4063_v15 = vld [vmem:[%s5598_s5 + $0x168] sm:$0xf0] }
 0x20f   :  { %1947 = vadd.xlane.f32.xlu0 %v1946_v41  ;;  %2647 = vmatpush.bf16.msra.mxu2 %v4198_v63  ;;  %v3922_v41 = vor.u32 %v4579_v39, %v3919_v40  ;;  %v4640_v63 = vld [vmem:[%s5598_s5 + $0x224] sm:$0xf0]  ;;  %v4191_v26 = vld [vmem:[%s5598_s5 + $0x268] sm:$0xf0] }
 0x210   :  { %2673 = vmatpush.bf16.msrb.mxu0 %v3946_v4  ;;  %2663 = vmatpush.bf16.msra.mxu3 %v4238_v60  ;;  %v4158_v1 = vor.u32 %v4640_v63, %v4157_v61  ;;  %v3903_v4 = vld [vmem:[%s5598_s5 + $0x28] sm:$0xf0] }
 0x211   :  { %v3906_v6 = vor.u32 %v4575_v3, %v3903_v4 }
 0x212   :  { %2689 = vmatpush.bf16.msrb.mxu1 %v3986_v44 }
 0x213   :  { %2648 = vmatpush.bf16.msra.mxu2 %v4190_v8  ;;  %v4149_v8 = vld [vmem:[%s5598_s5 + $0x210] sm:$0xf] }
 0x214   :  { %2674 = vmatpush.bf16.msrb.mxu0 %v3938_v19  ;;  %2664 = vmatpush.bf16.msra.mxu3 %v4230_v55  ;;  %v4150_v19 = vor.u32 %v4638_v12, %v4149_v8  ;;  %v4199_v8 = vld [vmem:[%s5598_s5 + $0x278] sm:$0xf0] }
 0x215   :  { %v4263_v12 = vld [vmem:[%s5598_s5 + $0x2f8] sm:$0xf0] }
 0x216   :  { %2690 = vmatpush.bf16.msrb.mxu1 %v3978_v57 }
 0x217   :  { %2649 = vmatpush.bf16.msra.mxu2 %v4182_v22  ;;  %v4141_v22 = vld [vmem:[%s5598_s5 + $0x200] sm:$0xf] }
 0x218   :  { %2675 = vmatpush.bf16.msrb.mxu0 %v3930_v27  ;;  %2665 = vmatpush.bf16.msra.mxu3 %v4222_v5  ;;  %v4142_v25 = vor.u32 %v4636_v23, %v4141_v22  ;;  %v4571_v27 = vld [vmem:[%s5598_s5 + $0x4] sm:$0xf]  ;;  %v4071_v5 = vld [vmem:[%s5598_s5 + $0x178] sm:$0xf0]  ;;  %v4127_v23 = vld [vmem:[%s5598_s5 + $0x1e8] sm:$0xf0] }
 0x219   :  { %v3890_v37 = vor.u32 %v4571_v27, %v3887_v29  ;;  %v4074_v16 = vor.u32 %v4617_v0, %v4071_v5  ;;  %v4631_v22 = vld [vmem:[%s5598_s5 + $0x1e4] sm:$0xf]  ;;  %v4255_v27 = vld [vmem:[%s5598_s5 + $0x2e8] sm:$0xf0]  ;;  %v1973_v29 = vperm.slane %v5289_v43, 4 }
 0x21a   :  { %2691 = vmatpush.bf16.msrb.mxu1 %v3970_v11  ;;  %v4665_v11 = vld [vmem:[%s5598_s5 + $0x2f4] sm:$0xf]  ;;  %v4039_v5 = vld [vmem:[%s5598_s5 + $0x138] sm:$0xf0] }
 0x21b   :  { %2650 = vmatpush.bf16.msra.mxu2 %v4174_v36  ;;  %v3954_v36 = vor.u32 %v4587_v32, %v3951_v34  ;;  %v4130_v32 = vor.u32 %v4631_v22, %v4127_v23  ;;  %v4613_v34 = vld [vmem:[%s5598_s5 + $0x154] sm:$0xf]  ;;  %v4623_v22 = vld [vmem:[%s5598_s5 + $0x1a4] sm:$0xf]  ;;  %v4095_v23 = vld [vmem:[%s5598_s5 + $0x1a8] sm:$0xf0] }
 0x21c   :  { %2676 = vmatpush.bf16.msrb.mxu0 %v3922_v41  ;;  %2666 = vmatpush.bf16.msra.mxu3 %v4214_v13  ;;  %v4615_v13 = vld [vmem:[%s5598_s5 + $0x164] sm:$0xf] }
 0x21e   :  { %2692 = vmatpush.bf16.msrb.mxu1 %v3962_v21  ;;  %v4266_v21 = vor.u32 %v4665_v11, %v4263_v12 }
 0x21f   :  { %2651 = vmatpush.bf16.msra.mxu2 %v4166_v49  ;;  %v1970_v49 = vperm.slane %v5289_v43, 1 }
 0x220   :  { %2677 = vmatpush.bf16.msrb.mxu0 %v3914_v56  ;;  %2667 = vmatpush.bf16.msra.mxu3 %v4206_v28  ;;  %v4066_v28 = vor.u32 %v4615_v13, %v4063_v15  ;;  %v4607_v13 = vld [vmem:[%s5598_s5 + $0x124] sm:$0xf]  ;;  %v4031_v15 = vld [vmem:[%s5598_s5 + $0x128] sm:$0xf0] }
 0x222   :  { %2693 = vmatpush.bf16.msrb.mxu1 %v3954_v36 }
 0x223   :  { %2652 = vmatpush.bf16.msra.mxu2 %v4158_v1 }
 0x224   :  { %2678 = vmatpush.bf16.msrb.mxu0 %v3906_v6 }
 0x227   :  { %2653 = vmatpush.bf16.msra.mxu2 %v4150_v19 }
 0x228   :  { %2679 = vmatpush.bf16.msrb.mxu0 %v3898_v20 }
 0x22b   :  { %2654 = vmatpush.bf16.msra.mxu2 %v4142_v25  ;;  %v4647_v25 = vld [vmem:[%s5598_s5 + $0x264] sm:$0xf] }
 0x22c   :  { %2680 = vmatpush.bf16.msrb.mxu0 %v3890_v37 }
 0x282   :  { %v1948_v35 = vpop.xlane.xlu0 %1947 }
 0x283   :  { %v1949_v38 = vmul.f32 %v1948_v35, %v4970_v52  ;;  %v5294_v52 = vld [vmem:[%s5597_s4] sm:$0x3f]  ;;  %v4055_v35 = vld [vmem:[%s5598_s5 + $0x158] sm:$0xf0] }
 0x284   :  { %v1989_v48 = vperm.slane %v5294_v52, 0  ;;  %v1990_v55 = vperm.slane %v5294_v52, 1  ;;  %v1991_v56 = vperm.slane %v5294_v52, 2  ;;  %v1992_v58 = vperm.slane %v5294_v52, 3 }
 0x285   :  { %v1950_v39 = vadd.f32 1e-06, %v1949_v38  ;;  %v1974_v38 = vperm.slane %v5289_v43, 5  ;;  %v4247_v43 = vld [vmem:[%s5598_s5 + $0x2d8] sm:$0xf0] }
 0x287   :  { %4690 = vrsqrt.f32 %v1950_v39  ;;  %vm1957_vm2 = vweird.f32 %v1950_v39 }
 0x28d   :  { %v4691_v40 = vpop.eup %4690 }
 0x28e   :  { %v1952_v60 = vmul.f32 %v4691_v40, %v1950_v39  ;;  %vm1958_vm1 = vweird.f32 %v4691_v40  ;;  %v4194_v39 = vor.u32 %v4647_v25, %v4191_v26  ;;  %v4639_v25 = vld [vmem:[%s5598_s5 + $0x224] sm:$0xf]  ;;  %v4159_v26 = vld [vmem:[%s5598_s5 + $0x228] sm:$0xf0] }
 0x28f   :  { %vm1959_vm3 = vmor %vm1957_vm2, %vm1958_vm1 }
 0x290   :  { %v1953_v41 = vmul.f32 %v4691_v40, %v1952_v60  ;;  %v4629_v60 = vld [vmem:[%s5598_s5 + $0x1d4] sm:$0xf] }
 0x292   :  { %v1954_v42 = vmul.f32 0.5, %v1953_v41  ;;  %v4119_v41 = vld [vmem:[%s5598_s5 + $0x1d8] sm:$0xf0] }
 0x294   :  { %v1955_v44 = vsub.f32 1.5, %v1954_v42  ;;  %v4661_v42 = vld [vmem:[%s5598_s5 + $0x2d4] sm:$0xf] }
 0x296   :  { %v1956_v46 = vmul.f32 %v4691_v40, %v1955_v44  ;;  %v4058_v44 = vor.u32 %v4613_v34, %v4055_v35  ;;  %v4023_v34 = vld [vmem:[%s5598_s5 + $0x118] sm:$0xf0]  ;;  %v4162_v35 = vor.u32 %v4639_v25, %v4159_v26 }
 0x298   :  { %v1960_v53 = vsel %vm1959_vm3, %v4691_v40, %v1956_v46  ;;  %v4258_v40 = vor.u32 %v4663_v30, %v4255_v27  ;;  %v1993_v46 = vperm.slane %v5294_v52, 4  ;;  %v4655_v30 = vld [vmem:[%s5598_s5 + $0x2a4] sm:$0xf]  ;;  %v4223_v27 = vld [vmem:[%s5598_s5 + $0x2a8] sm:$0xf0] }
 0x299   :  { %v1961_v59 = vmul.f32 %v1960_v53, %v5007_v33  ;;  %v1962_v57 = vmul.f32 %v1960_v53, %v5010_v9  ;;  %v1963_v61 = vmul.f32 %v1960_v53, %v5013_v10  ;;  %v1964_v63 = vmul.f32 %v1960_v53, %v5025_v14  ;;  %v4633_v33 = vld [vmem:[%s5598_s5 + $0x1f4] sm:$0xf]  ;;  %v4135_v9 = vld [vmem:[%s5598_s5 + $0x1f8] sm:$0xf0] }
 0x29a   :  { %v4649_v10 = vld [vmem:[%s5598_s5 + $0x274] sm:$0xf]  ;;  %v4138_v54 = vor.u32 %v4633_v33, %v4135_v9  ;;  %v1965_v37 = vmul.f32 %v1960_v53, %v5047_v24  ;;  %v1966_v36 = vmul.f32 %v1960_v53, %v5061_v45  ;;  %v4183_v45 = vld [vmem:[%s5598_s5 + $0x258] sm:$0xf0]  ;;  %v1994_v53 = vperm.slane %v5294_v52, 5 }
 0x29b   :  { %v1981_v1 = vmul.f32 %v1969_v47, %v1961_v59  ;;  %v1982_v2 = vmul.f32 %v1970_v49, %v1962_v57  ;;  %v1983_v3 = vmul.f32 %v1971_v50, %v1963_v61  ;;  %v1984_v4 = vmul.f32 %v1972_v51, %v1964_v63  ;;  %v4645_v24 = vld [vmem:[%s5598_s5 + $0x254] sm:$0xf]  ;;  %v4047_v49 = vld [vmem:[%s5598_s5 + $0x148] sm:$0xf0]  ;;  %v4643_v57 = vld [vmem:[%s5598_s5 + $0x244] sm:$0xf] }
 0x29c   :  { %v4202_v20 = vor.u32 %v4649_v10, %v4199_v8  ;;  %v4122_v47 = vor.u32 %v4629_v60, %v4119_v41  ;;  %v1985_v50 = vmul.f32 %v1973_v29, %v1965_v37  ;;  %v1986_v51 = vmul.f32 %v1974_v38, %v1966_v36  ;;  %v4111_v59 = vld [vmem:[%s5598_s5 + $0x1c8] sm:$0xf0]  ;;  %v4659_v61 = vld [vmem:[%s5598_s5 + $0x2c4] sm:$0xf]  ;;  %v4625_v10 = vld [vmem:[%s5598_s5 + $0x1b4] sm:$0xf] }
 0x29d   :  { %v2001_v14 = vadd.f32 %v1989_v48, %v1981_v1  ;;  %v2002_v6 = vadd.f32 %v1990_v55, %v1982_v2  ;;  %v2003_v7 = vadd.f32 %v1991_v56, %v1983_v3  ;;  %v2004_v31 = vadd.f32 %v1992_v58, %v1984_v4  ;;  %v4611_v48 = vld [vmem:[%s5598_s5 + $0x144] sm:$0xf]  ;;  %v4175_v52 = vld [vmem:[%s5598_s5 + $0x248] sm:$0xf0]  ;;  %v4609_v4 = vld [vmem:[%s5598_s5 + $0x134] sm:$0xf] }
 0x29e   :  { %v4186_v55 = vor.u32 %v4645_v24, %v4183_v45  ;;  %v4250_v56 = vor.u32 %v4661_v42, %v4247_v43  ;;  %v4627_v58 = vld [vmem:[%s5598_s5 + $0x1c4] sm:$0xf]  ;;  %v4239_v63 = vld [vmem:[%s5598_s5 + $0x2c8] sm:$0xf0]  ;;  %v4050_v0 = vor.u32 %v4611_v48, %v4047_v49  ;;  %v2005_v2 = vadd.f32 %v1993_v46, %v1985_v50  ;;  %v4231_v8 = vld [vmem:[%s5598_s5 + $0x2b8] sm:$0xf0] }
 0x29f   :  { %v5332_v62 = vpack.c.bf16 %v2001_v14, %v2001_v14  ;;  %v5334_v17 = vpack.c.bf16 %v2002_v6, %v2002_v6  ;;  %v5336_v18 = vpack.c.bf16 %v2003_v7, %v2003_v7  ;;  %v5338_v19 = vpack.c.bf16 %v2004_v31, %v2004_v31  ;;  %v4103_v14 = vld [vmem:[%s5598_s5 + $0x1b8] sm:$0xf0]  ;;  %v4641_v6 = vld [vmem:[%s5598_s5 + $0x234] sm:$0xf]  ;;  %v4603_v24 = vld [vmem:[%s5598_s5 + $0x104] sm:$0xf] }
 0x2a0   :  { %v4114_v1 = vor.u32 %v4627_v58, %v4111_v59  ;;  %v2006_v3 = vadd.f32 %v1994_v53, %v1986_v51  ;;  %v4178_v33 = vor.u32 %v4643_v57, %v4175_v52  ;;  %v4242_v9 = vor.u32 %v4659_v61, %v4239_v63  ;;  %v4167_v7 = vld [vmem:[%s5598_s5 + $0x238] sm:$0xf0]  ;;  %v4657_v31 = vld [vmem:[%s5598_s5 + $0x2b4] sm:$0xf]  ;;  %v4015_v45 = vld [vmem:[%s5598_s5 + $0x108] sm:$0xf0] }
 0x2a1   :  { %2603 = vmatmul.bf16.vlgmr.msrb.gmra.mxu2 %v5332_v62  ;;  %2616 = vmatmul.bf16.vlgmr.msrb.gmra.mxu3 %v5334_v17  ;;  %v4042_v11 = vor.u32 %v4609_v4, %v4039_v5  ;;  %v5446_v12 = vpack.c.bf16 %v2005_v2, %v2005_v2  ;;  %v4098_v29 = vor.u32 %v4623_v22, %v4095_v23  ;;  %v4637_v36 = vld [vmem:[%s5598_s5 + $0x214] sm:$0xf]  ;;  %v4151_v38 = vld [vmem:[%s5598_s5 + $0x218] sm:$0xf0]  ;;  %v4079_v46 = vld [vmem:[%s5598_s5 + $0x188] sm:$0xf0] }
 0x2a2   :  { %2629 = vmatmul.bf16.vlgmr.msra.gmra.mxu0 %v5336_v18  ;;  %2642 = vmatmul.bf16.vlgmr.msra.gmra.mxu1 %v5338_v19  ;;  %v4226_v37 = vor.u32 %v4655_v30, %v4223_v27  ;;  %v4154_v42 = vor.u32 %v4637_v36, %v4151_v38  ;;  %v4143_v48 = vld [vmem:[%s5598_s5 + $0x208] sm:$0xf0]  ;;  %v4651_v49 = vld [vmem:[%s5598_s5 + $0x284] sm:$0xf]  ;;  %v4018_v51 = vor.u32 %v4603_v24, %v4015_v45  ;;  %v4674_v58 = vld [vmem:[%s5600_s7 + $0x38] sm:$0xff] }
 0x2a3   :  { %2699 = vmatpush.bf16.msrb.mxu2 %v4074_v16  ;;  %2712 = vmatpush.bf16.msrb.mxu3 %v4138_v54  ;;  %v5448_v16 = vpack.c.bf16 %v2006_v3, %v2006_v3  ;;  %v4106_v54 = vor.u32 %v4625_v10, %v4103_v14  ;;  %v4207_v50 = vld [vmem:[%s5598_s5 + $0x288] sm:$0xf0]  ;;  %v4673_v59 = vld [vmem:[%s5600_s7 + $0x30] sm:$0xff]  ;;  %v4682_v61 = vld [vmem:[%s5600_s7 + $0x78] sm:$0xff] }
 0x2a4   :  { %2725 = vmatpush.bf16.msra.mxu0 %v4202_v20  ;;  %2738 = vmatpush.bf16.msra.mxu1 %v4266_v21  ;;  %v4170_v20 = vor.u32 %v4641_v6, %v4167_v7  ;;  %v4234_v21 = vor.u32 %v4657_v31, %v4231_v8  ;;  %v4672_v57 = vld [vmem:[%s5600_s7 + $0x28] sm:$0xff]  ;;  %v4669_v52 = vld [vmem:[%s5600_s7 + $0x10] sm:$0xff]  ;;  %v4679_v3 = vld [vmem:[%s5600_s7 + $0x60] sm:$0xff] }
 0x2a5   :  { %v4668_v63 = vld [vmem:[%s5600_s7 + $0x8] sm:$0xff]  ;;  %v4677_v7 = vld [vmem:[%s5600_s7 + $0x50] sm:$0xff] }
 0x2a6   :  { %v4680_v2 = vld [vmem:[%s5600_s7 + $0x68] sm:$0xff] }
 0x2a7   :  { %2700 = vmatpush.bf16.msrb.mxu2 %v4066_v28  ;;  %2713 = vmatpush.bf16.msrb.mxu3 %v4130_v32  ;;  %v4034_v28 = vor.u32 %v4607_v13, %v4031_v15  ;;  %v4605_v32 = vld [vmem:[%s5598_s5 + $0x114] sm:$0xf]  ;;  %v4675_v15 = vld [vmem:[%s5600_s7 + $0x40] sm:$0xff] }
 0x2a8   :  { %2726 = vmatpush.bf16.msra.mxu0 %v4194_v39  ;;  %2739 = vmatpush.bf16.msra.mxu1 %v4258_v40  ;;  %v4653_v39 = vld [vmem:[%s5598_s5 + $0x294] sm:$0xf]  ;;  %v4215_v40 = vld [vmem:[%s5598_s5 + $0x298] sm:$0xf0]  ;;  %v4026_v60 = vor.u32 %v4605_v32, %v4023_v34 }
 0x2a9   :  { %v4218_v43 = vor.u32 %v4653_v39, %v4215_v40 }
 0x2ab   :  { %2701 = vmatpush.bf16.msrb.mxu2 %v4058_v44  ;;  %2714 = vmatpush.bf16.msrb.mxu3 %v4122_v47  ;;  %v4619_v44 = vld [vmem:[%s5598_s5 + $0x184] sm:$0xf] }
 0x2ac   :  { %2727 = vmatpush.bf16.msra.mxu0 %v4186_v55  ;;  %2740 = vmatpush.bf16.msra.mxu1 %v4250_v56  ;;  %v4635_v47 = vld [vmem:[%s5598_s5 + $0x204] sm:$0xf]  ;;  %v4082_v53 = vor.u32 %v4619_v44, %v4079_v46  ;;  %v4210_v56 = vor.u32 %v4651_v49, %v4207_v50  ;;  %v4687_v50 = vld [vmem:[%s5601_s8] ss:$0 sm:$0xff] }
 0x2ad   :  { %v4146_v55 = vor.u32 %v4635_v47, %v4143_v48 }
 0x2af   :  { %2702 = vmatpush.bf16.msrb.mxu2 %v4050_v0  ;;  %2715 = vmatpush.bf16.msrb.mxu3 %v4114_v1  ;;  %v4681_v0 = vld [vmem:[%s5600_s7 + $0x70] sm:$0xff]  ;;  %v4667_v1 = vld [vmem:[%s5600_s7] sm:$0xff] }
 0x2b0   :  { %2728 = vmatpush.bf16.msra.mxu0 %v4178_v33  ;;  %2741 = vmatpush.bf16.msra.mxu1 %v4242_v9  ;;  %v2109_v33 = vld [vmem:[%s5599_s6] sm:$0x3]  ;;  %v4678_v9 = vld [vmem:[%s5600_s7 + $0x58] sm:$0xff] }
 0x2b1   :  { %2655 = vmatmul.bf16.vlgmr.msra.gmra.mxu2 %v5446_v12  ;;  %2668 = vmatmul.bf16.vlgmr.msra.gmra.mxu3 %v5448_v16  ;;  %v2111_v10 = vperm.slane %v2109_v33, 0  ;;  %v2112_v34 = vperm.slane %v2109_v33, 1 }
 0x2b2   :  { %2681 = vmatmul.bf16.vlgmr.msrb.gmra.mxu0 %v5332_v62  ;;  %2694 = vmatmul.bf16.vlgmr.msrb.gmra.mxu1 %v5334_v17  ;;  %v4621_v62 = vld [vmem:[%s5598_s5 + $0x194] sm:$0xf]  ;;  %v4087_v17 = vld [vmem:[%s5598_s5 + $0x198] sm:$0xf0] }
 0x2b3   :  { %2703 = vmatpush.bf16.msrb.mxu2 %v4042_v11  ;;  %2716 = vmatpush.bf16.msrb.mxu3 %v4106_v54  ;;  %v4090_v41 = vor.u32 %v4621_v62, %v4087_v17 }
 0x2b4   :  { %2729 = vmatpush.bf16.msra.mxu0 %v4170_v20  ;;  %2742 = vmatpush.bf16.msra.mxu1 %v4234_v21 }
 0x2b7   :  { %2704 = vmatpush.bf16.msrb.mxu2 %v4034_v28  ;;  %2717 = vmatpush.bf16.msrb.mxu3 %v4098_v29 }
 0x2b8   :  { %2730 = vmatpush.bf16.msra.mxu0 %v4162_v35  ;;  %2743 = vmatpush.bf16.msra.mxu1 %v4226_v37 }
 0x2bb   :  { %2705 = vmatpush.bf16.msrb.mxu2 %v4026_v60  ;;  %2718 = vmatpush.bf16.msrb.mxu3 %v4090_v41 }
 0x2bc   :  { %2731 = vmatpush.bf16.msra.mxu0 %v4154_v42  ;;  %2744 = vmatpush.bf16.msra.mxu1 %v4218_v43 }
 0x2bf   :  { %2706 = vmatpush.bf16.msrb.mxu2 %v4018_v51  ;;  %2719 = vmatpush.bf16.msrb.mxu3 %v4082_v53 }
 0x2c0   :  { %2732 = vmatpush.bf16.msra.mxu0 %v4146_v55  ;;  %2745 = vmatpush.bf16.msra.mxu1 %v4210_v56 }
 0x2c2   :  { %2707 = vmatmul.bf16.vlgmr.msrb.gmra.mxu2 %v5336_v18  ;;  %2720 = vmatmul.bf16.vlgmr.msrb.gmra.mxu3 %v5338_v19  ;;  %v4671_v18 = vld [vmem:[%s5600_s7 + $0x20] sm:$0xff]  ;;  %v4670_v19 = vld [vmem:[%s5600_s7 + $0x18] sm:$0xff] }
 0x2c3   :  { %2887 = vmatpush.bf16.msra.mxu2 %v4674_v58  ;;  %2733 = vmatmul.bf16.vlgmr.msra.gmra.mxu0 %v5446_v12  ;;  %v4676_v12 = vld [vmem:[%s5600_s7 + $0x48] sm:$0xff] }
 0x2c4   :  { %2746 = vmatmul.bf16.vlgmr.msra.gmra.mxu1 %v5448_v16  ;;  %2900 = vmatpush.bf16.msra.mxu3 %v4682_v61 }
 0x2c7   :  { %2888 = vmatpush.bf16.msra.mxu2 %v4673_v59 }
 0x2c8   :  { %2901 = vmatpush.bf16.msra.mxu3 %v4681_v0 }
 0x2cb   :  { %2889 = vmatpush.bf16.msra.mxu2 %v4672_v57 }
 0x2cc   :  { %2902 = vmatpush.bf16.msra.mxu3 %v4680_v2 }
 0x2cf   :  { %2890 = vmatpush.bf16.msra.mxu2 %v4671_v18 }
 0x2d0   :  { %2903 = vmatpush.bf16.msra.mxu3 %v4679_v3 }
 0x2d3   :  { %2891 = vmatpush.bf16.msra.mxu2 %v4670_v19 }
 0x2d4   :  { %2904 = vmatpush.bf16.msra.mxu3 %v4678_v9 }
 0x2d7   :  { %2892 = vmatpush.bf16.msra.mxu2 %v4669_v52 }
 0x2d8   :  { %2905 = vmatpush.bf16.msra.mxu3 %v4677_v7 }
 0x2db   :  { %2893 = vmatpush.bf16.msra.mxu2 %v4668_v63 }
 0x2dc   :  { %2906 = vmatpush.bf16.msra.mxu3 %v4676_v12 }
 0x2df   :  { %2894 = vmatpush.bf16.msra.mxu2 %v4667_v1 }
 0x2e0   :  { %2907 = vmatpush.bf16.msra.mxu3 %v4675_v15 }
 0x31f   :  { %v2630_v4 = vpop.f32.mrf.mxu0  ;;  %v2643_v5 = vpop.f32.mrf.mxu1 }
 0x324   :  { %v2604_v14 = vpop.f32.mrf.mxu2  ;;  %v2617_v6 = vpop.f32.mrf.mxu3 }
 0x325   :  { %v2605_v31 = vadd.f32 %v2604_v14, %v2111_v10 }
 0x327   :  { %v2632_v8 = vpop.f32.mrf.mxu0  ;;  %v2645_v11 = vpop.f32.mrf.mxu1  ;;  %v2618_v16 = vadd.f32 %v2617_v6, %v2605_v31 }
 0x329   :  { %v2631_v20 = vadd.f32 %v2630_v4, %v2618_v16 }
 0x32b   :  { %v2644_v23 = vadd.f32 %v2643_v5, %v2631_v20 }
 0x32c   :  { %v2606_v54 = vpop.f32.mrf.mxu2  ;;  %v2619_v13 = vpop.f32.mrf.mxu3 }
 0x32f   :  { %v2682_v21 = vpop.f32.mrf.mxu0  ;;  %v2695_v22 = vpop.f32.mrf.mxu1 }
 0x330   :  { %v2683_v62 = vadd.f32 %v2682_v21, %v2112_v34 }
 0x332   :  { %v2696_v38 = vadd.f32 %v2695_v22, %v2683_v62 }
 0x334   :  { %v2656_v25 = vpop.f32.mrf.mxu2  ;;  %v2669_v26 = vpop.f32.mrf.mxu3 }
 0x335   :  { %v2657_v30 = vadd.f32 %v2656_v25, %v2644_v23 }
 0x337   :  { %v2670_v27 = vadd.f32 %v2669_v26, %v2657_v30  ;;  %v2684_v28 = vpop.f32.mrf.mxu0  ;;  %v2697_v29 = vpop.f32.mrf.mxu1 }
 0x339   :  { %2751 = vst [vmem:[%s5602_s9] sm:$0xff] %v2670_v27  ;;  %v2753_v32 = vpack.c.bf16 %v2670_v27, %v2670_v27 }
 0x33b   :  { %2895 = vmatmul.bf16.vlgmr.msra.gmra.mxu2 %v2753_v32 }
 0x33c   :  { %v2658_v35 = vpop.f32.mrf.mxu2  ;;  %v2671_v37 = vpop.f32.mrf.mxu3 }
 0x340   :  { %v2734_v17 = vpop.f32.mrf.mxu0 }
 0x341   :  { %v2747_v36 = vpop.f32.mrf.mxu1 }
 0x345   :  { %v2708_v39 = vpop.f32.mrf.mxu2  ;;  %v2721_v40 = vpop.f32.mrf.mxu3 }
 0x346   :  { %v2709_v60 = vadd.f32 %v2708_v39, %v2696_v38 }
 0x348   :  { %v2722_v41 = vadd.f32 %v2721_v40, %v2709_v60  ;;  %v2736_v24 = vpop.f32.mrf.mxu0 }
 0x349   :  { %v2749_v45 = vpop.f32.mrf.mxu1 }
 0x34a   :  { %v2735_v42 = vadd.f32 %v2734_v17, %v2722_v41 }
 0x34c   :  { %v2748_v43 = vadd.f32 %v2747_v36, %v2735_v42 }
 0x34d   :  { %v2710_v44 = vpop.f32.mrf.mxu2  ;;  %v2723_v46 = vpop.f32.mrf.mxu3 }
 0x34e   :  { %2752 = vst [vmem:[%s5602_s9 + $0x8] sm:$0xff] %v2748_v43  ;;  %v2754_v47 = vpack.c.bf16 %v2748_v43, %v2748_v43 }
 0x350   :  { %2908 = vmatmul.bf16.vlgmr.msra.gmra.mxu3 %v2754_v47 }
 0x3be   :  { %v2896_v48 = vpop.f32.mrf.mxu2 }
 0x3bf   :  { %v2897_v51 = vadd.f32 %v4687_v50, %v2896_v48 }
 0x3c6   :  { %v2898_v49 = vpop.f32.mrf.mxu2 }
 0x3d3   :  { %v2909_v53 = vpop.f32.mrf.mxu3 }
 0x3d4   :  { %v2910_v55 = vadd.f32 %v2909_v53, %v2897_v51 }
 0x3d6   :  { %2913 = vst [vmem:[%s5603_s10] sm:$0xff] %v2910_v55 }
 0x3db   :  { %v2911_v56 = vpop.f32.mrf.mxu3 }
 0x3dc   :  { %2922 = vsyncpa [#allocation3], 1 }

</bundles_post_ra>
